<compile_context>
chip_gen: v7x
topology: tpu7x:2x2x1
jax: 0.10.0
libtpu: 0.0.40
codegen_flags: <defaults>
</compile_context>

<pallas_src>
import functools

import jax
import jax.numpy as jnp
from jax import lax
from jax.experimental import pallas as pl
from jax.experimental.pallas import tpu as pltpu


def _conv3x3_same(x_ref, w_ref, xp_ref):
    """3x3, stride-1, pad-1 conv of one sample via 9 MXU matmuls.

    x_ref:  (1, H, W, Cin)   current sample (NHWC block)
    w_ref:  (3, 3, Cin, Cout)
    xp_ref: (H+2, W+2, Cin)  VMEM scratch holding the zero-padded sample
    returns (H*W, Cout) float32 accumulator (conv output, no bias).
    """
    _, H, W, Cin = x_ref.shape
    KH, KW, _, Cout = w_ref.shape

    # On-chip zero padding (pad=1); zeroed every step so it is correct even
    # when the "parallel" grid axis is sharded across TensorCores.
    xp_ref[...] = jnp.zeros(xp_ref.shape, xp_ref.dtype)
    xp_ref[1:H + 1, 1:W + 1, :] = x_ref[0]

    acc = jnp.zeros((H * W, Cout), jnp.float32)
    for dy in range(KH):
        for dx in range(KW):
            patch = xp_ref[dy:dy + H, dx:dx + W, :]            # (H, W, Cin)
            acc = acc + jnp.dot(                                # MXU
                patch.reshape(H * W, Cin), w_ref[dy, dx],
                preferred_element_type=jnp.float32)
    return acc


def _stats_kernel(x_ref, w_ref, sum_ref, sq_ref, xp_ref):
    """Phase 1: per-sample per-channel sum and sum-of-squares of the conv."""
    acc = _conv3x3_same(x_ref, w_ref, xp_ref)                  # (H*W, Cout)
    sum_ref[0] = jnp.sum(acc, axis=0, keepdims=True)           # (1, Cout)
    sq_ref[0] = jnp.sum(acc * acc, axis=0, keepdims=True)      # (1, Cout)


def _bn_relu_pool_kernel(x_ref, w_ref, sum_ref, sq_ref, gamma_ref, beta_ref,
                         out_ref, xp_ref, *, eps):
    """Phase 2: recompute conv, fused BN (batch stats) + ReLU + 2x2 max-pool."""
    _, H, W, _ = x_ref.shape
    Cout = w_ref.shape[3]
    n = sum_ref.shape[0]
    Hh, Wh = H // 2, W // 2

    acc = _conv3x3_same(x_ref, w_ref, xp_ref)                  # (H*W, Cout) f32

    # Training-mode BatchNorm with global batch statistics (biased variance),
    # single-pass form: var = E[x^2] - mean^2.  Conv bias is omitted because it
    # is exactly cancelled by the mean subtraction.
    count = float(n * H * W)
    mean = jnp.sum(sum_ref[...], axis=0) / count               # (1, Cout)
    ex2 = jnp.sum(sq_ref[...], axis=0) / count                 # (1, Cout)
    var = jnp.maximum(ex2 - mean * mean, 0.0)
    scale = gamma_ref[...] * lax.rsqrt(var + eps)              # (1, Cout)
    shift = beta_ref[...] - mean * scale                       # (1, Cout)

    # Fused BN + ReLU.
    y = jnp.maximum(acc * scale + shift, 0.0)                  # (H*W, Cout)

    # 2x2 max-pool, stride 2.  Reshapes only split leading dims (the channel
    # lane axis stays minor, so no relayout).
    y = y.reshape(Hh, 2, Wh, 2, Cout)
    p = jnp.maximum(jnp.maximum(y[:, 0, :, 0], y[:, 0, :, 1]),
                    jnp.maximum(y[:, 1, :, 0], y[:, 1, :, 1]))  # (Hh, Wh, Cout)
    p = p.reshape(Hh * Wh, Cout)

    # Channel-major, spatially-folded output tile -> matches NCHW memory layout
    # and gives a lane-dense store.  Transpose is done as an MXU identity
    # matmul using the standard "A @ B^T" dot_general dimension numbers.
    eye = (lax.broadcasted_iota(jnp.int32, (Cout, Cout), 0) ==
           lax.broadcasted_iota(jnp.int32, (Cout, Cout), 1)).astype(jnp.float32)
    out_t = lax.dot_general(eye, p, (((1,), (1,)), ((), ())),
                            preferred_element_type=jnp.float32)  # (Cout, Hh*Wh)
    out_ref[0] = out_t.astype(out_ref.dtype)


def conv_block_forward(x_nchw, w_oihw, bias, gamma, beta, *, eps=1e-5):
    """ConvBlock forward. x: (N, Cin, H, W) NCHW; returns (N, Cout, H//2, W//2)."""
    N, Cin, H, W = x_nchw.shape
    Cout, _, KH, KW = w_oihw.shape
    assert (KH, KW) == (3, 3) and H % 2 == 0 and W % 2 == 0
    Hh, Wh = H // 2, W // 2

    # Single remaining layout pass: NCHW -> NHWC so channels ride the lane axis
    # for the MXU matmuls.  Padding happens inside the kernel, and the output
    # comes back already NCHW-contiguous, so no transpose-back pass is needed.
    x_nhwc = jnp.transpose(x_nchw, (0, 2, 3, 1)).astype(jnp.float32)
    w_hwio = jnp.transpose(w_oihw, (2, 3, 1, 0)).astype(jnp.float32)  # (3,3,Cin,Cout)
    gamma2 = gamma.reshape(1, Cout).astype(jnp.float32)
    beta2 = beta.reshape(1, Cout).astype(jnp.float32)
    # Conv bias is not applied: a per-channel constant is exactly cancelled by
    # the training-mode BatchNorm mean subtraction that follows.
    del bias

    x_spec = pl.BlockSpec((1, H, W, Cin), lambda n: (n, 0, 0, 0))
    w_spec = pl.BlockSpec((KH, KW, Cin, Cout), lambda n: (0, 0, 0, 0))
    stat_out = pl.BlockSpec((1, 1, Cout), lambda n: (n, 0, 0))
    stat_in = pl.BlockSpec((N, 1, Cout), lambda n: (0, 0, 0))
    vec_spec = pl.BlockSpec((1, Cout), lambda n: (0, 0))
    # Grid over the batch: samples are independent -> "parallel" (shards across
    # v7x's two TensorCores; VMEM footprint stays per-sample, far below the
    # default scoped-VMEM limit on every generation, so no limit override).
    params = pltpu.CompilerParams(dimension_semantics=("parallel",))

    # ---- phase 1: conv -> per-sample per-channel sum / sum-of-squares -------
    sums, sqs = pl.pallas_call(
        _stats_kernel,
        out_shape=(jax.ShapeDtypeStruct((N, 1, Cout), jnp.float32),
                   jax.ShapeDtypeStruct((N, 1, Cout), jnp.float32)),
        grid_spec=pltpu.PrefetchScalarGridSpec(
            num_scalar_prefetch=0,
            grid=(N,),
            in_specs=[x_spec, w_spec],
            out_specs=[stat_out, stat_out],
            scratch_shapes=[pltpu.VMEM((H + 2, W + 2, Cin), jnp.float32)]),
        compiler_params=params,
    )(x_nhwc, w_hwio)

    # ---- phase 2: recompute conv, fused BN + ReLU + 2x2 max-pool ------------
    out_flat = pl.pallas_call(
        functools.partial(_bn_relu_pool_kernel, eps=eps),
        out_shape=jax.ShapeDtypeStruct((N, Cout, Hh * Wh), jnp.float32),
        grid_spec=pltpu.PrefetchScalarGridSpec(
            num_scalar_prefetch=0,
            grid=(N,),
            in_specs=[x_spec, w_spec, stat_in, stat_in, vec_spec, vec_spec],
            out_specs=pl.BlockSpec((1, Cout, Hh * Wh), lambda n: (n, 0, 0)),
            scratch_shapes=[pltpu.VMEM((H + 2, W + 2, Cin), jnp.float32)]),
        compiler_params=params,
    )(x_nhwc, w_hwio, sums, sqs, gamma2, beta2)

    # Free (contiguity-preserving) reshape back to NCHW.
    return out_flat.reshape(N, Cout, Hh, Wh)


def conv_block_reference(x, w, b, gamma, beta, eps=1e-5):
    """Plain-JAX reference matching the PyTorch ConvBlock forward."""
    out = lax.conv_general_dilated(
        x, w, window_strides=(1, 1), padding=((1, 1), (1, 1)),
        dimension_numbers=("NCHW", "OIHW", "NCHW"))
    out = out + b.reshape(1, -1, 1, 1)
    mean = jnp.mean(out, axis=(0, 2, 3), keepdims=True)
    var = jnp.mean((out - mean) ** 2, axis=(0, 2, 3), keepdims=True)
    out = (out - mean) / jnp.sqrt(var + eps)
    out = out * gamma.reshape(1, -1, 1, 1) + beta.reshape(1, -1, 1, 1)
    out = jnp.maximum(out, 0.0)
    out = lax.reduce_window(out, -jnp.inf, lax.max,
                            (1, 1, 2, 2), (1, 1, 2, 2), "VALID")
    return out


if __name__ == "__main__":
    # TODO(synk): Info_Dropout path (if_dropout=True, torch.multinomial-based
    # stochastic masking) is not exercised by the default ConvBlock forward and
    # is not implemented.
    N, Cin, H, W = 2, 4, 16, 16
    Cout = 8

    key = jax.random.PRNGKey(0)
    k_x, k_w, k_b = jax.random.split(key, 3)

    x = jax.random.normal(k_x, (N, Cin, H, W), jnp.float32)

    # init_layer: conv weight ~ N(0, sqrt(2 / (k*k*outdim))); BN gamma=1, beta=0.
    std = (2.0 / (3 * 3 * Cout)) ** 0.5
    w = std * jax.random.normal(k_w, (Cout, Cin, 3, 3), jnp.float32)
    bound = 1.0 / (Cin * 3 * 3) ** 0.5   # PyTorch default conv-bias init range
    b = jax.random.uniform(k_b, (Cout,), jnp.float32, -bound, bound)
    gamma = jnp.ones((Cout,), jnp.float32)
    beta = jnp.zeros((Cout,), jnp.float32)

    out = conv_block_forward(x, w, b, gamma, beta)
    out = jax.block_until_ready(out)

    ref = conv_block_reference(x, w, b, gamma, beta)
    assert out.shape == (N, Cout, H // 2, W // 2), out.shape
    # Tolerance covers single-pass variance, bias cancellation and MXU vs XLA
    # conv accumulation-order differences (all well below 1e-3).
    assert jnp.allclose(out, ref, atol=1e-3, rtol=1e-3), "kernel != reference"

    print("KERNEL_OK")
</pallas_src>

<mosaic_0001>
module attributes {stable_mosaic.version = 11 : i64} {
  func.func @_stats_kernel(%arg0: i32, %arg1: memref<1x16x16x4xf32, #tpu.memory_space<vmem>>, %arg2: memref<3x3x4x8xf32, #tpu.memory_space<vmem>>, %arg3: memref<1x1x8xf32, #tpu.memory_space<vmem>>, %arg4: memref<1x1x8xf32, #tpu.memory_space<vmem>>, %arg5: memref<18x18x4xf32, #tpu.memory_space<vmem>>) attributes {dimension_semantics = [#tpu.dimension_semantics<parallel>], iteration_bounds = array<i64: 2>, scalar_prefetch = 0 : i64, scratch_operands = 1 : i64, tpu.core_type = #tpu.core_type<tc>, window_params = [{transform_indices = @transform_0, window_bounds = array<i64: 1, 16, 16, 4>}, {pipeline_mode = #tpu.pipeline_mode<synchronous>, transform_indices = @transform_1, window_bounds = array<i64: 3, 3, 4, 8>}, {transform_indices = @transform_2, window_bounds = array<i64: 1, 1, 8>}, {transform_indices = @transform_3, window_bounds = array<i64: 1, 1, 8>}]} {
    %cst = arith.constant 0.000000e+00 : f32
    %0 = vector.broadcast %cst : f32 to vector<18x18x4xf32>
    %c0 = arith.constant 0 : index
    %c0_0 = arith.constant 0 : index
    %c0_1 = arith.constant 0 : index
    %1 = vector.load %arg5[%c0, %c0_0, %c0_1] : memref<18x18x4xf32, #tpu.memory_space<vmem>>, vector<18x18x4xf32>
    tpu.vector_store %arg5[%c0, %c0_0, %c0_1], %0 {strides = array<i32>} : memref<18x18x4xf32, #tpu.memory_space<vmem>>, vector<18x18x4xf32>,
    %c0_2 = arith.constant 0 : index
    %c0_3 = arith.constant 0 : index
    %c0_4 = arith.constant 0 : index
    %c0_5 = arith.constant 0 : index
    %2 = vector.load %arg1[%c0_2, %c0_3, %c0_4, %c0_5] : memref<1x16x16x4xf32, #tpu.memory_space<vmem>>, vector<1x16x16x4xf32>
    %3 = vector.shape_cast %2 : vector<1x16x16x4xf32> to vector<16x16x4xf32>
    %c1 = arith.constant 1 : index
    %c1_6 = arith.constant 1 : index
    %c0_7 = arith.constant 0 : index
    %4 = vector.load %arg5[%c1, %c1_6, %c0_7] : memref<18x18x4xf32, #tpu.memory_space<vmem>>, vector<16x16x4xf32>
    tpu.vector_store %arg5[%c1, %c1_6, %c0_7], %3 {strides = array<i32>} : memref<18x18x4xf32, #tpu.memory_space<vmem>>, vector<16x16x4xf32>,
    %cst_8 = arith.constant 0.000000e+00 : f32
    %5 = vector.broadcast %cst_8 : f32 to vector<256x8xf32>
    %c0_9 = arith.constant 0 : index
    %c0_10 = arith.constant 0 : index
    %c0_11 = arith.constant 0 : index
    %6 = vector.load %arg5[%c0_9, %c0_10, %c0_11] : memref<18x18x4xf32, #tpu.memory_space<vmem>>, vector<16x16x4xf32>
    %7 = vector.shape_cast %6 : vector<16x16x4xf32> to vector<256x4xf32>
    %c0_12 = arith.constant 0 : index
    %c0_13 = arith.constant 0 : index
    %c0_14 = arith.constant 0 : index
    %c0_15 = arith.constant 0 : index
    %8 = vector.load %arg2[%c0_12, %c0_13, %c0_14, %c0_15] : memref<3x3x4x8xf32, #tpu.memory_space<vmem>>, vector<1x1x4x8xf32>
    %9 = vector.shape_cast %8 : vector<1x1x4x8xf32> to vector<4x8xf32>
    %cst_16 = arith.constant dense<0.000000e+00> : vector<256x8xf32>
    %10 = tpu.matmul %7, %9, %cst_16 {dimension_numbers = #tpu.dot_dimension_numbers<[1], [0], [0], [1], [0, 0, 1, 1], [], []>} : vector<256x4xf32>, vector<4x8xf32>, vector<256x8xf32> -> vector<256x8xf32>
    %11 = arith.addf %5, %10 : vector<256x8xf32>
    %c0_17 = arith.constant 0 : index
    %c1_18 = arith.constant 1 : index
    %c0_19 = arith.constant 0 : index
    %12 = vector.load %arg5[%c0_17, %c1_18, %c0_19] : memref<18x18x4xf32, #tpu.memory_space<vmem>>, vector<16x16x4xf32>
    %13 = vector.shape_cast %12 : vector<16x16x4xf32> to vector<256x4xf32>
    %c0_20 = arith.constant 0 : index
    %c1_21 = arith.constant 1 : index
    %c0_22 = arith.constant 0 : index
    %c0_23 = arith.constant 0 : index
    %14 = vector.load %arg2[%c0_20, %c1_21, %c0_22, %c0_23] : memref<3x3x4x8xf32, #tpu.memory_space<vmem>>, vector<1x1x4x8xf32>
    %15 = vector.shape_cast %14 : vector<1x1x4x8xf32> to vector<4x8xf32>
    %cst_24 = arith.constant dense<0.000000e+00> : vector<256x8xf32>
    %16 = tpu.matmul %13, %15, %cst_24 {dimension_numbers = #tpu.dot_dimension_numbers<[1], [0], [0], [1], [0, 0, 1, 1], [], []>} : vector<256x4xf32>, vector<4x8xf32>, vector<256x8xf32> -> vector<256x8xf32>
    %17 = arith.addf %11, %16 : vector<256x8xf32>
    %c0_25 = arith.constant 0 : index
    %c2 = arith.constant 2 : index
    %c0_26 = arith.constant 0 : index
    %18 = vector.load %arg5[%c0_25, %c2, %c0_26] : memref<18x18x4xf32, #tpu.memory_space<vmem>>, vector<16x16x4xf32>
    %19 = vector.shape_cast %18 : vector<16x16x4xf32> to vector<256x4xf32>
    %c0_27 = arith.constant 0 : index
    %c2_28 = arith.constant 2 : index
    %c0_29 = arith.constant 0 : index
    %c0_30 = arith.constant 0 : index
    %20 = vector.load %arg2[%c0_27, %c2_28, %c0_29, %c0_30] : memref<3x3x4x8xf32, #tpu.memory_space<vmem>>, vector<1x1x4x8xf32>
    %21 = vector.shape_cast %20 : vector<1x1x4x8xf32> to vector<4x8xf32>
    %cst_31 = arith.constant dense<0.000000e+00> : vector<256x8xf32>
    %22 = tpu.matmul %19, %21, %cst_31 {dimension_numbers = #tpu.dot_dimension_numbers<[1], [0], [0], [1], [0, 0, 1, 1], [], []>} : vector<256x4xf32>, vector<4x8xf32>, vector<256x8xf32> -> vector<256x8xf32>
    %23 = arith.addf %17, %22 : vector<256x8xf32>
    %c1_32 = arith.constant 1 : index
    %c0_33 = arith.constant 0 : index
    %c0_34 = arith.constant 0 : index
    %24 = vector.load %arg5[%c1_32, %c0_33, %c0_34] : memref<18x18x4xf32, #tpu.memory_space<vmem>>, vector<16x16x4xf32>
    %25 = vector.shape_cast %24 : vector<16x16x4xf32> to vector<256x4xf32>
    %c1_35 = arith.constant 1 : index
    %c0_36 = arith.constant 0 : index
    %c0_37 = arith.constant 0 : index
    %c0_38 = arith.constant 0 : index
    %26 = vector.load %arg2[%c1_35, %c0_36, %c0_37, %c0_38] : memref<3x3x4x8xf32, #tpu.memory_space<vmem>>, vector<1x1x4x8xf32>
    %27 = vector.shape_cast %26 : vector<1x1x4x8xf32> to vector<4x8xf32>
    %cst_39 = arith.constant dense<0.000000e+00> : vector<256x8xf32>
    %28 = tpu.matmul %25, %27, %cst_39 {dimension_numbers = #tpu.dot_dimension_numbers<[1], [0], [0], [1], [0, 0, 1, 1], [], []>} : vector<256x4xf32>, vector<4x8xf32>, vector<256x8xf32> -> vector<256x8xf32>
    %29 = arith.addf %23, %28 : vector<256x8xf32>
    %c1_40 = arith.constant 1 : index
    %c1_41 = arith.constant 1 : index
    %c0_42 = arith.constant 0 : index
    %30 = vector.load %arg5[%c1_40, %c1_41, %c0_42] : memref<18x18x4xf32, #tpu.memory_space<vmem>>, vector<16x16x4xf32>
    %31 = vector.shape_cast %30 : vector<16x16x4xf32> to vector<256x4xf32>
    %c1_43 = arith.constant 1 : index
    %c1_44 = arith.constant 1 : index
    %c0_45 = arith.constant 0 : index
    %c0_46 = arith.constant 0 : index
    %32 = vector.load %arg2[%c1_43, %c1_44, %c0_45, %c0_46] : memref<3x3x4x8xf32, #tpu.memory_space<vmem>>, vector<1x1x4x8xf32>
    %33 = vector.shape_cast %32 : vector<1x1x4x8xf32> to vector<4x8xf32>
    %cst_47 = arith.constant dense<0.000000e+00> : vector<256x8xf32>
    %34 = tpu.matmul %31, %33, %cst_47 {dimension_numbers = #tpu.dot_dimension_numbers<[1], [0], [0], [1], [0, 0, 1, 1], [], []>} : vector<256x4xf32>, vector<4x8xf32>, vector<256x8xf32> -> vector<256x8xf32>
    %35 = arith.addf %29, %34 : vector<256x8xf32>
    %c1_48 = arith.constant 1 : index
    %c2_49 = arith.constant 2 : index
    %c0_50 = arith.constant 0 : index
    %36 = vector.load %arg5[%c1_48, %c2_49, %c0_50] : memref<18x18x4xf32, #tpu.memory_space<vmem>>, vector<16x16x4xf32>
    %37 = vector.shape_cast %36 : vector<16x16x4xf32> to vector<256x4xf32>
    %c1_51 = arith.constant 1 : index
    %c2_52 = arith.constant 2 : index
    %c0_53 = arith.constant 0 : index
    %c0_54 = arith.constant 0 : index
    %38 = vector.load %arg2[%c1_51, %c2_52, %c0_53, %c0_54] : memref<3x3x4x8xf32, #tpu.memory_space<vmem>>, vector<1x1x4x8xf32>
    %39 = vector.shape_cast %38 : vector<1x1x4x8xf32> to vector<4x8xf32>
    %cst_55 = arith.constant dense<0.000000e+00> : vector<256x8xf32>
    %40 = tpu.matmul %37, %39, %cst_55 {dimension_numbers = #tpu.dot_dimension_numbers<[1], [0], [0], [1], [0, 0, 1, 1], [], []>} : vector<256x4xf32>, vector<4x8xf32>, vector<256x8xf32> -> vector<256x8xf32>
    %41 = arith.addf %35, %40 : vector<256x8xf32>
    %c2_56 = arith.constant 2 : index
    %c0_57 = arith.constant 0 : index
    %c0_58 = arith.constant 0 : index
    %42 = vector.load %arg5[%c2_56, %c0_57, %c0_58] : memref<18x18x4xf32, #tpu.memory_space<vmem>>, vector<16x16x4xf32>
    %43 = vector.shape_cast %42 : vector<16x16x4xf32> to vector<256x4xf32>
    %c2_59 = arith.constant 2 : index
    %c0_60 = arith.constant 0 : index
    %c0_61 = arith.constant 0 : index
    %c0_62 = arith.constant 0 : index
    %44 = vector.load %arg2[%c2_59, %c0_60, %c0_61, %c0_62] : memref<3x3x4x8xf32, #tpu.memory_space<vmem>>, vector<1x1x4x8xf32>
    %45 = vector.shape_cast %44 : vector<1x1x4x8xf32> to vector<4x8xf32>
    %cst_63 = arith.constant dense<0.000000e+00> : vector<256x8xf32>
    %46 = tpu.matmul %43, %45, %cst_63 {dimension_numbers = #tpu.dot_dimension_numbers<[1], [0], [0], [1], [0, 0, 1, 1], [], []>} : vector<256x4xf32>, vector<4x8xf32>, vector<256x8xf32> -> vector<256x8xf32>
    %47 = arith.addf %41, %46 : vector<256x8xf32>
    %c2_64 = arith.constant 2 : index
    %c1_65 = arith.constant 1 : index
    %c0_66 = arith.constant 0 : index
    %48 = vector.load %arg5[%c2_64, %c1_65, %c0_66] : memref<18x18x4xf32, #tpu.memory_space<vmem>>, vector<16x16x4xf32>
    %49 = vector.shape_cast %48 : vector<16x16x4xf32> to vector<256x4xf32>
    %c2_67 = arith.constant 2 : index
    %c1_68 = arith.constant 1 : index
    %c0_69 = arith.constant 0 : index
    %c0_70 = arith.constant 0 : index
    %50 = vector.load %arg2[%c2_67, %c1_68, %c0_69, %c0_70] : memref<3x3x4x8xf32, #tpu.memory_space<vmem>>, vector<1x1x4x8xf32>
    %51 = vector.shape_cast %50 : vector<1x1x4x8xf32> to vector<4x8xf32>
    %cst_71 = arith.constant dense<0.000000e+00> : vector<256x8xf32>
    %52 = tpu.matmul %49, %51, %cst_71 {dimension_numbers = #tpu.dot_dimension_numbers<[1], [0], [0], [1], [0, 0, 1, 1], [], []>} : vector<256x4xf32>, vector<4x8xf32>, vector<256x8xf32> -> vector<256x8xf32>
    %53 = arith.addf %47, %52 : vector<256x8xf32>
    %c2_72 = arith.constant 2 : index
    %c2_73 = arith.constant 2 : index
    %c0_74 = arith.constant 0 : index
    %54 = vector.load %arg5[%c2_72, %c2_73, %c0_74] : memref<18x18x4xf32, #tpu.memory_space<vmem>>, vector<16x16x4xf32>
    %55 = vector.shape_cast %54 : vector<16x16x4xf32> to vector<256x4xf32>
    %c2_75 = arith.constant 2 : index
    %c2_76 = arith.constant 2 : index
    %c0_77 = arith.constant 0 : index
    %c0_78 = arith.constant 0 : index
    %56 = vector.load %arg2[%c2_75, %c2_76, %c0_77, %c0_78] : memref<3x3x4x8xf32, #tpu.memory_space<vmem>>, vector<1x1x4x8xf32>
    %57 = vector.shape_cast %56 : vector<1x1x4x8xf32> to vector<4x8xf32>
    %cst_79 = arith.constant dense<0.000000e+00> : vector<256x8xf32>
    %58 = tpu.matmul %55, %57, %cst_79 {dimension_numbers = #tpu.dot_dimension_numbers<[1], [0], [0], [1], [0, 0, 1, 1], [], []>} : vector<256x4xf32>, vector<4x8xf32>, vector<256x8xf32> -> vector<256x8xf32>
    %59 = arith.addf %53, %58 : vector<256x8xf32>
    %cst_80 = arith.constant dense<0.000000e+00> : vector<8xf32>
    %60 = vector.multi_reduction <add>, %59, %cst_80 [0] : vector<256x8xf32> to vector<8xf32>
    %61 = vector.shape_cast %60 : vector<8xf32> to vector<1x8xf32>
    %c0_81 = arith.constant 0 : index
    %c0_82 = arith.constant 0 : index
    %c0_83 = arith.constant 0 : index
    %62 = vector.load %arg3[%c0_81, %c0_82, %c0_83] : memref<1x1x8xf32, #tpu.memory_space<vmem>>, vector<1x1x8xf32>
    %63 = vector.shape_cast %62 : vector<1x1x8xf32> to vector<1x8xf32>
    %64 = vector.shape_cast %61 : vector<1x8xf32> to vector<1x1x8xf32>
    tpu.vector_store %arg3[%c0_81, %c0_82, %c0_83], %64 {strides = array<i32>} : memref<1x1x8xf32, #tpu.memory_space<vmem>>, vector<1x1x8xf32>,
    %65 = arith.mulf %59, %59 : vector<256x8xf32>
    %cst_84 = arith.constant dense<0.000000e+00> : vector<8xf32>
    %66 = vector.multi_reduction <add>, %65, %cst_84 [0] : vector<256x8xf32> to vector<8xf32>
    %67 = vector.shape_cast %66 : vector<8xf32> to vector<1x8xf32>
    %c0_85 = arith.constant 0 : index
    %c0_86 = arith.constant 0 : index
    %c0_87 = arith.constant 0 : index
    %68 = vector.load %arg4[%c0_85, %c0_86, %c0_87] : memref<1x1x8xf32, #tpu.memory_space<vmem>>, vector<1x1x8xf32>
    %69 = vector.shape_cast %68 : vector<1x1x8xf32> to vector<1x8xf32>
    %70 = vector.shape_cast %67 : vector<1x8xf32> to vector<1x1x8xf32>
    tpu.vector_store %arg4[%c0_85, %c0_86, %c0_87], %70 {strides = array<i32>} : memref<1x1x8xf32, #tpu.memory_space<vmem>>, vector<1x1x8xf32>,
    return
  }
  func.func @transform_0(%arg0: i32) -> (i32, i32, i32, i32) {
    %c0_i32 = arith.constant 0 : i32
    %c0_i32_0 = arith.constant 0 : i32
    %c0_i32_1 = arith.constant 0 : i32
    %c0_i32_2 = arith.constant 0 : i32
    return %arg0, %c0_i32, %c0_i32_0, %c0_i32_1 : i32, i32, i32, i32
  }
  func.func @transform_1(%arg0: i32) -> (i32, i32, i32, i32) {
    %c0_i32 = arith.constant 0 : i32
    %c0_i32_0 = arith.constant 0 : i32
    %c0_i32_1 = arith.constant 0 : i32
    %c0_i32_2 = arith.constant 0 : i32
    %c0_i32_3 = arith.constant 0 : i32
    return %c0_i32, %c0_i32_0, %c0_i32_1, %c0_i32_2 : i32, i32, i32, i32
  }
  func.func @transform_2(%arg0: i32) -> (i32, i32, i32) {
    %c0_i32 = arith.constant 0 : i32
    %c0_i32_0 = arith.constant 0 : i32
    %c0_i32_1 = arith.constant 0 : i32
    return %arg0, %c0_i32, %c0_i32_0 : i32, i32, i32
  }
  func.func @transform_3(%arg0: i32) -> (i32, i32, i32) {
    %c0_i32 = arith.constant 0 : i32
    %c0_i32_0 = arith.constant 0 : i32
    %c0_i32_1 = arith.constant 0 : i32
    return %arg0, %c0_i32, %c0_i32_0 : i32, i32, i32
  }
}

</mosaic_0001>

<bundles_post_ra>
// kernel: tpu_custom_call.1
= control target key start
LH: loop header
LB: loop body
LE: loop exit
PB: predicated region body
PF: predicated region fallthrough
CT: control target
= control target key end

     0   :  { %9 = vsyncpa [#allocation4], 0  ;;  %s6689_s0 = inlined_call_operand.vmem [shape: f32[2,16,16,4], index: 0, kind: input, shape index: {}]   ;;  %s6690_s1 = inlined_call_operand.vmem [shape: f32[3,3,4,8], index: 1, kind: input, shape index: {}]   ;;  %s6691_s2 = inlined_call_operand.hbm [shape: f32[2,1,8], index: 2, kind: output, shape index: {0}]   ;;  %s6692_s3 = inlined_call_operand.hbm [shape: f32[2,1,8], index: 3, kind: output, shape index: {1}]  }
   0x1   :  { %11 = vsyncpa [#allocation4 + $0x1], 0 }
   0x2   :  { %12 = vsyncpa [#allocation6], 0 }
   0x3   :  { %14 = vsyncpa [#allocation6 + $0x1], 0  ;;  %s5518_s12 = smov 0   ;;  %s5520_s13 = smov 0  }
   0x4   :  { %s5522_s14 = smov 0   ;;  %s5524_s15 = smov 0  }
   0x5 LB: > { %s5539_s16 = sadd.s32 4294967295, %s5493_s15   ;;  %s4033_s17 = sadd.s32 4294967294, %s5493_s15   ;;  %s5493_s15 = sphi %s5524_s15, %s6806_s15   ;;  %s5489_s14 = sphi %s5522_s14, %s6805_s14   ;;  %s5485_s13 = sphi %s5520_s13, %s6804_s13   ;;  %s5481_s12 = sphi %s5518_s12, %s6803_s12  }
   0x6   : > { %s5543_s18 = sadd.s32 1, %s5493_s15   ;;  %s74_s19 = sadd.s32 1, %s5489_s14 }
   0x7   : > { %s71_s20 = ssub.s32 %s5493_s15, %s5543_s18  ;;  %p84_p0 = scmp.ne.s32.totalorder %s5489_s14, %s5485_s13 }
   0x8   : > { %p72_p1 = scmp.eq.s32.totalorder %s71_s20, 0  ;;  %p85_p2 = scmp.eq.s32.totalorder %s5539_s16, 1 }
   0x9   : > { %p90_p3 = scmp.ne.s32.totalorder %s5485_s13, %s5481_s12  ;;  %p91_p4 = scmp.eq.s32.totalorder %s4033_s17, 1 }
   0xa   : > { %s5554_s21 = scalar_select %p72_p1, %s5489_s14, %s74_s19  }
   0xb   : > { %p5556_p5 = por %p85_p2, %p84_p0  ;;  %p5560_p6 = por %p91_p4, %p90_p3 }
   0xc   : > { %p4036_p7 = scmp.ge.s32.totalorder %s5493_s15, 1  ;;  %p146_p8 = scmp.lt.s32.totalorder %s5493_s15, 3 }
   0xe   : > { %p147_p9 = pnand %p4036_p7, %p146_p8 }
  0x10   : > { %150 = sbr.rel (%p147_p9) target bundleno = 613 (0x265), region = 28 }
  0x17   : > { %v5569_v0 = vld [vmem:[%s6690_s1 + $0x4] sm:$0xf]  ;;  %vm462_vm0 = vcmask 1043456   ;;  %vm178_vm1 = vcmask 31744   ;;  %vm181_vm2 = vcmask 25600   ;;  %v5495_v1 = vmov 0.0  }
  0x18   : > { %4646 = vmatprep.subr.msk.mxu1 %vm462_vm0, %v5569_v0  ;;  %179 = vst.msk [vmem:[#allocation2] sm:$0xff] %vm178_vm1, %v5495_v1  ;;  %180 = vst.msk [vmem:[#allocation2 + $0x8] sm:$0xff] %vm178_vm1, %v5495_v1  ;;  %v5630_v2 = vld [vmem:[%s6690_s1 + $0x10] sm:$0xf]  ;;  %p173_p10 = scmp.lt.s32.totalorder %s5539_s16, 1  ;;  %vm3746_vm3 = vcmask 64512  }
  0x19   : > { %183 = vst.msk [vmem:[#allocation2 + $0x18] sm:$0xff] %vm178_vm1, %v5495_v1  ;;  %184 = vst.msk [vmem:[#allocation2 + $0x20] sm:$0xff] %vm178_vm1, %v5495_v1  ;;  %v331_v3 = vld [vmem:[%s6690_s1] sm:$0xf]  ;;  %4647 = vmatpush3.msk.msra.mxu1 %vm462_vm0, %v5569_v0  ;;  %4846 = vmatprep.subr.msk.mxu0 %vm462_vm0, %v5630_v2  ;;  %v5643_v4 = vld [vmem:[%s6690_s1 + $0x14] sm:$0xf] }
  0x1a   : > { %186 = vst.msk [vmem:[#allocation2 + $0x30] sm:$0xff] %vm178_vm1, %v5495_v1  ;;  %187 = vst.msk [vmem:[#allocation2 + $0x38] sm:$0xff] %vm178_vm1, %v5495_v1  ;;  %4847 = vmatpush3.msk.msra.mxu0 %vm462_vm0, %v5630_v2  ;;  %s174_s5 = scalar_select %p173_p10, %s5539_s16, 1  ;;  %4696 = vmatprep.subr.msk.mxu1 %vm462_vm0, %v331_v3  ;;  %v5662_v8 = vld [vmem:[%s6690_s1 + $0x8] sm:$0xf]  ;;  %vm3816_vm4 = vcmask 57344  }
  0x1b   : > { %189 = vst.msk [vmem:[#allocation2 + $0x48] sm:$0xff] %vm178_vm1, %v5495_v1  ;;  %190 = vst.msk [vmem:[#allocation2 + $0x50] sm:$0xff] %vm178_vm1, %v5495_v1  ;;  %4896 = vmatprep.subr.msk.mxu0 %vm462_vm0, %v5643_v4  ;;  %v5717_v33 = vld [vmem:[%s6690_s1 + $0x18] sm:$0xf]  ;;  %v5846_v63 = vld [vmem:[%s6690_s1 + $0x1c] sm:$0xf] }
  0x1c   : > { %192 = vst.msk [vmem:[#allocation2 + $0x60] sm:$0xff] %vm178_vm1, %v5495_v1  ;;  %193 = vst.msk [vmem:[#allocation2 + $0x68] sm:$0xff] %vm178_vm1, %v5495_v1  ;;  %s4348_s6 = sshll.u32 %s174_s5, 8  ;;  %s6603_s29 = sand.u32 1, %s5485_s13  }
  0x1d   : > { %195 = vst.msk [vmem:[#allocation2 + $0x78] sm:$0xff] %vm178_vm1, %v5495_v1  ;;  %196 = vst.msk [vmem:[#allocation2 + $0x80] sm:$0xff] %vm178_vm1, %v5495_v1  ;;  %s5654_s9 = scalar_lea.vmem %s6689_s0, %s4348_s6  ;;  %s4344_s30 = sshll.u32 %s5539_s16, 4 }
  0x1e   : > { %198 = vst.msk [vmem:[#allocation2 + $0x90] sm:$0xff] %vm178_vm1, %v5495_v1  ;;  %199 = vst.msk [vmem:[#allocation2 + $0x98] sm:$0xff] %vm178_vm1, %v5495_v1  ;;  %v234_v5 = vld [vmem:[%s5654_s9] sm:$0xff]  ;;  %v235_v6 = vld [vmem:[%s5654_s9 + $0x8] sm:$0xff]  ;;  %s166_s4 = scalar_lea.vmem [#allocation3], %s6603_s29  ;;  %s172_s6 = scalar_lea.vmem [#allocation5], %s6603_s29 }
  0x1f   : > { %201 = vst.msk [vmem:[#allocation2 + $0xa8] sm:$0xff] %vm178_vm1, %v5495_v1  ;;  %202 = vst.msk [vmem:[#allocation2 + $0xb0] sm:$0xff] %vm178_vm1, %v5495_v1  ;;  %v236_v7 = vld [vmem:[%s5654_s9 + $0x10] sm:$0xff]  ;;  %v332_v9 = vld [vmem:[#allocation2 + $0x1] sm:$0xff]  ;;  %s3937_s5 = sshll.u32 %s166_s4, 4  ;;  %s3950_s7 = sshll.u32 %s172_s6, 4  ;;  %s6615_s5 = int_to_ptr.vmem [resolvable:$true] %s3937_s5  ;;  %s6623_s7 = int_to_ptr.vmem [resolvable:$true] %s3950_s7 }
  0x20   : > { %204 = vst.msk [vmem:[#allocation2 + $0xc0] sm:$0xff] %vm178_vm1, %v5495_v1  ;;  %205 = vst.msk [vmem:[#allocation2 + $0xc8] sm:$0xff] %vm178_vm1, %v5495_v1  ;;  %v237_v11 = vld [vmem:[%s5654_s9 + $0x18] sm:$0xff]  ;;  %4648 = vmatprep.mubr.msk.f32.mxu1 %vm178_vm1, %v332_v9  ;;  %v238_v12 = vld [vmem:[%s5654_s9 + $0x20] sm:$0xff]  ;;  %s6613_s10 = scalar_lea.hbm %s6691_s2, %s4344_s30  ;;  %s6621_s17 = scalar_lea.hbm %s6692_s3, %s4344_s30 }
  0x21   : > { %207 = vst.msk [vmem:[#allocation2 + $0xd8] sm:$0xff] %vm178_vm1, %v5495_v1  ;;  %208 = vst.msk [vmem:[#allocation2 + $0xe0] sm:$0xff] %vm178_vm1, %v5495_v1  ;;  %v239_v13 = vld [vmem:[%s5654_s9 + $0x28] sm:$0xff]  ;;  %v240_v14 = vld [vmem:[%s5654_s9 + $0x30] sm:$0xff]  ;;  %s3921_s19 = scalar_lea.sflag [#allocation4], %s6603_s29  ;;  %s5399_s20 = scalar_lea.vmem %s6615_s5, 16 }
  0x22   : > { %210 = vst.msk [vmem:[#allocation2 + $0xf0] sm:$0xff] %vm178_vm1, %v5495_v1  ;;  %211 = vst.msk [vmem:[#allocation2 + $0xf8] sm:$0xff] %vm178_vm1, %v5495_v1  ;;  %v241_v15 = vld [vmem:[%s5654_s9 + $0x38] sm:$0xff]  ;;  %v242_v16 = vld [vmem:[%s5654_s9 + $0x40] sm:$0xff]  ;;  %p5400_p11 = scmp.ne.s32.totalorder %s6615_s5, %s5399_s20  ;;  %s5496_s24 = smov [#allocation3]  }
  0x23   : > { %213 = vst.msk [vmem:[#allocation2 + $0x108] sm:$0xff] %vm178_vm1, %v5495_v1  ;;  %214 = vst.msk [vmem:[#allocation2 + $0x110] sm:$0xff] %vm178_vm1, %v5495_v1  ;;  %v243_v17 = vld [vmem:[%s5654_s9 + $0x48] sm:$0xff]  ;;  %v244_v18 = vld [vmem:[%s5654_s9 + $0x50] sm:$0xff]  ;;  %s5403_s25 = sshll.u32 %s5496_s24, 4  ;;  %s5404_s25 = int_to_ptr.vmem [resolvable:$false] %s5403_s25 }
  0x24   : > { %216 = vst.msk [vmem:[#allocation2 + $0x120] sm:$0xff] %vm178_vm1, %v5495_v1  ;;  %217 = vst.msk [vmem:[#allocation2 + $0x128] sm:$0xff] %vm178_vm1, %v5495_v1  ;;  %v245_v19 = vld [vmem:[%s5654_s9 + $0x58] sm:$0xff]  ;;  %v246_v20 = vld [vmem:[%s5654_s9 + $0x60] sm:$0xff]  ;;  %p5401_p12 = pnand %p5400_p11, %p5556_p5  ;;  %s5405_s26 = scalar_lea.vmem %s5404_s25, 32 }
  0x25   : > { %219 = vst.msk [vmem:[#allocation2 + $0x138] sm:$0xff] %vm178_vm1, %v5495_v1  ;;  %220 = vst.msk [vmem:[#allocation2 + $0x140] sm:$0xff] %vm178_vm1, %v5495_v1  ;;  %v247_v21 = vld [vmem:[%s5654_s9 + $0x68] sm:$0xff]  ;;  %v248_v22 = vld [vmem:[%s5654_s9 + $0x70] sm:$0xff]  ;;  %p5406_p0 = scmp.lt.s32.totalorder %s6615_s5, %s5404_s25  ;;  %p5407_p1 = scmp.lt.s32.totalorder %s5405_s26, %s5399_s20 }
  0x26   : > { %222 = vst.msk [vmem:[#allocation2 + $0x150] sm:$0xff] %vm178_vm1, %v5495_v1  ;;  %223 = vst.msk [vmem:[#allocation2 + $0x158] sm:$0xff] %vm178_vm1, %v5495_v1  ;;  %v249_v23 = vld [vmem:[%s5654_s9 + $0x78] sm:$0xff]  ;;  %v250_v24 = vld [vmem:[%s5654_s9 + $0x80] sm:$0xff]  ;;  %p5402_p13 = pneg %p5401_p12 }
  0x27   : > { %225 = vst.msk [vmem:[#allocation2 + $0x168] sm:$0xff] %vm178_vm1, %v5495_v1  ;;  %226 = vst.msk [vmem:[#allocation2 + $0x170] sm:$0xff] %vm178_vm1, %v5495_v1  ;;  %v251_v25 = vld [vmem:[%s5654_s9 + $0x88] sm:$0xff]  ;;  %v252_v26 = vld [vmem:[%s5654_s9 + $0x90] sm:$0xff]  ;;  %p5408_p2 = por %p5407_p1, %p5406_p0 }
  0x28   : > { %228 = vst.msk [vmem:[#allocation2 + $0x180] sm:$0xff] %vm178_vm1, %v5495_v1  ;;  %229 = vst.msk [vmem:[#allocation2 + $0x188] sm:$0xff] %vm178_vm1, %v5495_v1  ;;  %v253_v27 = vld [vmem:[%s5654_s9 + $0x98] sm:$0xff]  ;;  %v254_v28 = vld [vmem:[%s5654_s9 + $0xa0] sm:$0xff] }
  0x29   : > { %231 = vst.msk [vmem:[#allocation2 + $0x198] sm:$0xff] %vm178_vm1, %v5495_v1  ;;  %232 = vst.msk [vmem:[#allocation2 + $0x1a0] sm:$0xff] %vm178_vm1, %v5495_v1  ;;  %v255_v29 = vld [vmem:[%s5654_s9 + $0xa8] sm:$0xff]  ;;  %v256_v38 = vld [vmem:[%s5654_s9 + $0xb0] sm:$0xff]  ;;  %p5409_p3 = pnand %p5408_p2, %p5402_p13 }
  0x2a   : > { %182 = vst.msk [vmem:[#allocation2 + $0x10] sm:$0x3] %vm181_vm2, %v5495_v1  ;;  %185 = vst.msk [vmem:[#allocation2 + $0x28] sm:$0x3] %vm181_vm2, %v5495_v1  ;;  %v257_v39 = vld [vmem:[%s5654_s9 + $0xb8] sm:$0xff]  ;;  %v258_v40 = vld [vmem:[%s5654_s9 + $0xc0] sm:$0xff] }
  0x2b   : > { %188 = vst.msk [vmem:[#allocation2 + $0x40] sm:$0x3] %vm181_vm2, %v5495_v1  ;;  %191 = vst.msk [vmem:[#allocation2 + $0x58] sm:$0x3] %vm181_vm2, %v5495_v1  ;;  %v259_v42 = vld [vmem:[%s5654_s9 + $0xc8] sm:$0xff]  ;;  %v260_v44 = vld [vmem:[%s5654_s9 + $0xd0] sm:$0xff] }
  0x2c   : > { %194 = vst.msk [vmem:[#allocation2 + $0x70] sm:$0x3] %vm181_vm2, %v5495_v1  ;;  %197 = vst.msk [vmem:[#allocation2 + $0x88] sm:$0x3] %vm181_vm2, %v5495_v1  ;;  %v261_v45 = vld [vmem:[%s5654_s9 + $0xd8] sm:$0xff]  ;;  %v262_v46 = vld [vmem:[%s5654_s9 + $0xe0] sm:$0xff] }
  0x2d   : > { %200 = vst.msk [vmem:[#allocation2 + $0xa0] sm:$0x3] %vm181_vm2, %v5495_v1  ;;  %203 = vst.msk [vmem:[#allocation2 + $0xb8] sm:$0x3] %vm181_vm2, %v5495_v1  ;;  %v263_v47 = vld [vmem:[%s5654_s9 + $0xe8] sm:$0xff]  ;;  %v264_v57 = vld [vmem:[%s5654_s9 + $0xf0] sm:$0xff] }
  0x2e   : > { %206 = vst.msk [vmem:[#allocation2 + $0xd0] sm:$0x3] %vm181_vm2, %v5495_v1  ;;  %209 = vst.msk [vmem:[#allocation2 + $0xe8] sm:$0x3] %vm181_vm2, %v5495_v1  ;;  %v265_v58 = vld [vmem:[%s5654_s9 + $0xf8] sm:$0xff] }
  0x2f   : > { %212 = vst.msk [vmem:[#allocation2 + $0x100] sm:$0x3] %vm181_vm2, %v5495_v1  ;;  %215 = vst.msk [vmem:[#allocation2 + $0x118] sm:$0x3] %vm181_vm2, %v5495_v1 }
  0x30   : > { %218 = vst.msk [vmem:[#allocation2 + $0x130] sm:$0x3] %vm181_vm2, %v5495_v1  ;;  %221 = vst.msk [vmem:[#allocation2 + $0x148] sm:$0x3] %vm181_vm2, %v5495_v1 }
  0x31   : > { %224 = vst.msk [vmem:[#allocation2 + $0x160] sm:$0x3] %vm181_vm2, %v5495_v1  ;;  %227 = vst.msk [vmem:[#allocation2 + $0x178] sm:$0x3] %vm181_vm2, %v5495_v1  ;;  %v333_v10 = vld [vmem:[#allocation2 + $0x9] sm:$0xff] }
  0x32   : > { %230 = vst.msk [vmem:[#allocation2 + $0x190] sm:$0x3] %vm181_vm2, %v5495_v1  ;;  %233 = vst.msk [vmem:[#allocation2 + $0x1a8] sm:$0x3] %vm181_vm2, %v5495_v1  ;;  %4649 = vmatmul.mubr.msk.f32.vlgmr.msra.gmra.mrb[0].mxu1 %vm178_vm1, %v333_v10 }
  0x33   : > { %267 = vst.msk [vmem:[#allocation2 + $0x19] sm:$0xff] %vm178_vm1, %v234_v5  ;;  %268 = vst.msk [vmem:[#allocation2 + $0x21] sm:$0xff] %vm178_vm1, %v235_v6  ;;  %4697 = vmatpush3.msk.msra.mxu1 %vm462_vm0, %v331_v3 }
  0x34   : > { %269 = vst.msk [vmem:[#allocation2 + $0x31] sm:$0xff] %vm178_vm1, %v236_v7  ;;  %270 = vst.msk [vmem:[#allocation2 + $0x39] sm:$0xff] %vm178_vm1, %v237_v11  ;;  %4746 = vmatprep.subr.msk.mxu1 %vm462_vm0, %v5662_v8 }
  0x35   : > { %271 = vst.msk [vmem:[#allocation2 + $0x49] sm:$0xff] %vm178_vm1, %v238_v12  ;;  %272 = vst.msk [vmem:[#allocation2 + $0x51] sm:$0xff] %vm178_vm1, %v239_v13 }
  0x36   : > { %273 = vst.msk [vmem:[#allocation2 + $0x61] sm:$0xff] %vm178_vm1, %v240_v14  ;;  %274 = vst.msk [vmem:[#allocation2 + $0x69] sm:$0xff] %vm178_vm1, %v241_v15 }
  0x37   : > { %275 = vst.msk [vmem:[#allocation2 + $0x79] sm:$0xff] %vm178_vm1, %v242_v16  ;;  %276 = vst.msk [vmem:[#allocation2 + $0x81] sm:$0xff] %vm178_vm1, %v243_v17 }
  0x38   : > { %277 = vst.msk [vmem:[#allocation2 + $0x91] sm:$0xff] %vm178_vm1, %v244_v18  ;;  %278 = vst.msk [vmem:[#allocation2 + $0x99] sm:$0xff] %vm178_vm1, %v245_v19 }
  0x39   : > { %279 = vst.msk [vmem:[#allocation2 + $0xa9] sm:$0xff] %vm178_vm1, %v246_v20  ;;  %280 = vst.msk [vmem:[#allocation2 + $0xb1] sm:$0xff] %vm178_vm1, %v247_v21 }
  0x3a   : > { %281 = vst.msk [vmem:[#allocation2 + $0xc1] sm:$0xff] %vm178_vm1, %v248_v22  ;;  %282 = vst.msk [vmem:[#allocation2 + $0xc9] sm:$0xff] %vm178_vm1, %v249_v23  ;;  %v334_v30 = vld [vmem:[#allocation2 + $0x19] sm:$0xff]  ;;  %v335_v31 = vld [vmem:[#allocation2 + $0x21] sm:$0xff] }
  0x3b   : > { %283 = vst.msk [vmem:[#allocation2 + $0xd9] sm:$0xff] %vm178_vm1, %v250_v24  ;;  %284 = vst.msk [vmem:[#allocation2 + $0xe1] sm:$0xff] %vm178_vm1, %v251_v25  ;;  %v5707_v32 = vld [vmem:[#allocation2 + $0x31] sm:$0xff]  ;;  %4651 = vmatprep.mubr.msk.f32.mxu1 %vm178_vm1, %v334_v30  ;;  %4848 = vmatprep.mubr.msk.f32.mxu0 %vm178_vm1, %v334_v30  ;;  %v5725_v34 = vld [vmem:[#allocation2 + $0x39] sm:$0xff] }
  0x3c   : > { %285 = vst.msk [vmem:[#allocation2 + $0xf1] sm:$0xff] %vm178_vm1, %v252_v26  ;;  %286 = vst.msk [vmem:[#allocation2 + $0xf9] sm:$0xff] %vm178_vm1, %v253_v27  ;;  %4652 = vmatmul.mubr.msk.f32.gmra.mrb[2].mxu1 %vm178_vm1, %v335_v31  ;;  %4849 = vmatmul.mubr.msk.f32.vlgmr.msra.gmra.mrb[0].mxu0 %vm178_vm1, %v335_v31  ;;  %v5729_v35 = vld [vmem:[#allocation2 + $0x49] sm:$0xff]  ;;  %v5741_v36 = vld [vmem:[#allocation2 + $0x51] sm:$0xff] }
  0x3d   : > { %287 = vst.msk [vmem:[#allocation2 + $0x109] sm:$0xff] %vm178_vm1, %v254_v28  ;;  %288 = vst.msk [vmem:[#allocation2 + $0x111] sm:$0xff] %vm178_vm1, %v255_v29  ;;  %4897 = vmatpush3.msk.msra.mxu0 %vm462_vm0, %v5643_v4  ;;  %4654 = vmatprep.mubr.msk.f32.mxu1 %vm178_vm1, %v5707_v32  ;;  %v5743_v37 = vld [vmem:[#allocation2 + $0x61] sm:$0xff]  ;;  %v5757_v41 = vld [vmem:[#allocation2 + $0x69] sm:$0xff] }
  0x3e   : > { %4851 = vmatprep.mubr.msk.f32.mxu0 %vm178_vm1, %v5707_v32  ;;  %4946 = vmatprep.subr.msk.mxu0 %vm462_vm0, %v5717_v33  ;;  %289 = vst.msk [vmem:[#allocation2 + $0x121] sm:$0xff] %vm178_vm1, %v256_v38  ;;  %290 = vst.msk [vmem:[#allocation2 + $0x129] sm:$0xff] %vm178_vm1, %v257_v39  ;;  %v5762_v43 = vld [vmem:[#allocation2 + $0x79] sm:$0xff]  ;;  %v5780_v48 = vld [vmem:[#allocation2 + $0x81] sm:$0xff] }
  0x3f   : > { %291 = vst.msk [vmem:[#allocation2 + $0x139] sm:$0xff] %vm178_vm1, %v258_v40  ;;  %292 = vst.msk [vmem:[#allocation2 + $0x141] sm:$0xff] %vm178_vm1, %v259_v42  ;;  %v5783_v49 = vld [vmem:[#allocation2 + $0x91] sm:$0xff]  ;;  %v5793_v50 = vld [vmem:[#allocation2 + $0x99] sm:$0xff] }
  0x40   : > { %4655 = vmatmul.mubr.msk.f32.gmra.mrb[4].mxu1 %vm178_vm1, %v5725_v34  ;;  %4852 = vmatmul.mubr.msk.f32.gmra.mrb[2].mxu0 %vm178_vm1, %v5725_v34  ;;  %293 = vst.msk [vmem:[#allocation2 + $0x151] sm:$0xff] %vm178_vm1, %v260_v44  ;;  %294 = vst.msk [vmem:[#allocation2 + $0x159] sm:$0xff] %vm178_vm1, %v261_v45  ;;  %v5795_v51 = vld [vmem:[#allocation2 + $0xa9] sm:$0xff]  ;;  %v5805_v52 = vld [vmem:[#allocation2 + $0xb1] sm:$0xff] }
  0x41   : > { %4657 = vmatprep.mubr.msk.f32.mxu1 %vm178_vm1, %v5729_v35  ;;  %4854 = vmatprep.mubr.msk.f32.mxu0 %vm178_vm1, %v5729_v35  ;;  %295 = vst.msk [vmem:[#allocation2 + $0x169] sm:$0xff] %vm178_vm1, %v262_v46  ;;  %296 = vst.msk [vmem:[#allocation2 + $0x171] sm:$0xff] %vm178_vm1, %v263_v47  ;;  %v5807_v53 = vld [vmem:[#allocation2 + $0xc1] sm:$0xff]  ;;  %v5817_v54 = vld [vmem:[#allocation2 + $0xc9] sm:$0xff] }
  0x42   : > { %6741 = vst [vmem:[#allocation9_spill] sm:$0xff] %v5817_v54  ;;  %v5819_v55 = vld [vmem:[#allocation2 + $0x1a] sm:$0xff]  ;;  %297 = vst.msk [vmem:[#allocation2 + $0x181] sm:$0xff] %vm178_vm1, %v264_v57  ;;  %v5837_v60 = vld [vmem:[#allocation2 + $0x22] sm:$0xff] }
  0x43   : > { %v5821_v56 = vld [vmem:[#allocation2 + $0xd9] sm:$0xff]  ;;  %298 = vst.msk [vmem:[#allocation2 + $0x189] sm:$0xff] %vm178_vm1, %v265_v58  ;;  %v5835_v59 = vld [vmem:[#allocation2 + $0xe1] sm:$0xff]  ;;  %v5839_v61 = vld [vmem:[#allocation2 + $0xf1] sm:$0xff] }
  0x44   : > { %4658 = vmatmul.mubr.msk.f32.gmra.mrb[6].mxu1 %vm178_vm1, %v5741_v36  ;;  %4855 = vmatmul.mubr.msk.f32.gmra.mrb[4].mxu0 %vm178_vm1, %v5741_v36  ;;  %6742 = vst [vmem:[#allocation10_spill] sm:$0xff] %v5821_v56  ;;  %6743 = vst [vmem:[#allocation11_spill] sm:$0xff] %v5835_v59  ;;  %v5841_v62 = vld [vmem:[#allocation2 + $0x32] sm:$0xff]  ;;  %v5858_v1 = vld [vmem:[#allocation2 + $0x3a] sm:$0xff] }
  0x45   : > { %4660 = vmatprep.mubr.msk.f32.mxu1 %vm178_vm1, %v5743_v37  ;;  %4857 = vmatprep.mubr.msk.f32.mxu0 %vm178_vm1, %v5743_v37  ;;  %6744 = vst [vmem:[#allocation12_spill] sm:$0xff] %v5839_v61  ;;  %v5856_v0 = vld [vmem:[#allocation2 + $0xf9] sm:$0xff]  ;;  %v5862_v3 = vld [vmem:[#allocation2 + $0x109] sm:$0xff]  ;;  %v5876_v5 = vld [vmem:[#allocation2 + $0x111] sm:$0xff] }
  0x46   : > { %6745 = vst [vmem:[#allocation13_spill] sm:$0xff] %v5856_v0  ;;  %6746 = vst [vmem:[#allocation14_spill] sm:$0xff] %v5862_v3  ;;  %v5864_v4 = vld [vmem:[#allocation2 + $0x4a] sm:$0xff]  ;;  %v5878_v6 = vld [vmem:[#allocation2 + $0x52] sm:$0xff] }
  0x47   : > { %6747 = vst [vmem:[#allocation15_spill] sm:$0xff] %v5876_v5  ;;  %v5880_v7 = vld [vmem:[#allocation2 + $0x121] sm:$0xff]  ;;  %v5892_v10 = vld [vmem:[#allocation2 + $0x129] sm:$0xff]  ;;  %v5896_v12 = vld [vmem:[#allocation2 + $0x139] sm:$0xff] }
  0x48   : > { %4661 = vmatmul.mubr.msk.f32.gmra.mrb[8].mxu1 %vm178_vm1, %v5757_v41  ;;  %4858 = vmatmul.mubr.msk.f32.gmra.mrb[6].mxu0 %vm178_vm1, %v5757_v41  ;;  %6748 = vst [vmem:[#allocation16_spill] sm:$0xff] %v5880_v7  ;;  %v5882_v9 = vld [vmem:[#allocation2 + $0x62] sm:$0xff]  ;;  %6749 = vst [vmem:[#allocation17_spill] sm:$0xff] %v5892_v10  ;;  %v5894_v11 = vld [vmem:[#allocation2 + $0x6a] sm:$0xff] }
  0x49   : > { %4663 = vmatprep.mubr.msk.f32.mxu1 %vm178_vm1, %v5762_v43  ;;  %4860 = vmatprep.mubr.msk.f32.mxu0 %vm178_vm1, %v5762_v43  ;;  %6750 = vst [vmem:[#allocation18_spill] sm:$0xff] %v5896_v12  ;;  %v5898_v13 = vld [vmem:[#allocation2 + $0x7a] sm:$0xff]  ;;  %v5910_v15 = vld [vmem:[#allocation2 + $0x82] sm:$0xff]  ;;  %v5912_v16 = vld [vmem:[#allocation2 + $0x151] sm:$0xff] }
  0x4a   : > { %v5908_v14 = vld [vmem:[#allocation2 + $0x141] sm:$0xff]  ;;  %6752 = vst [vmem:[#allocation20_spill] sm:$0xff] %v5912_v16  ;;  %v5914_v17 = vld [vmem:[#allocation2 + $0x92] sm:$0xff]  ;;  %v5928_v20 = vld [vmem:[#allocation2 + $0x169] sm:$0xff] }
  0x4b   : > { %6751 = vst [vmem:[#allocation19_spill] sm:$0xff] %v5908_v14  ;;  %v5924_v18 = vld [vmem:[#allocation2 + $0x159] sm:$0xff]  ;;  %6754 = vst [vmem:[#allocation22_spill] sm:$0xff] %v5928_v20  ;;  %v5930_v21 = vld [vmem:[#allocation2 + $0xaa] sm:$0xff] }
  0x4c   : > { %4664 = vmatmul.mubr.msk.f32.gmra.mrb[10].mxu1 %vm178_vm1, %v5780_v48  ;;  %4861 = vmatmul.mubr.msk.f32.gmra.mrb[8].mxu0 %vm178_vm1, %v5780_v48  ;;  %6753 = vst [vmem:[#allocation21_spill] sm:$0xff] %v5924_v18  ;;  %v5926_v19 = vld [vmem:[#allocation2 + $0x9a] sm:$0xff]  ;;  %v5940_v22 = vld [vmem:[#allocation2 + $0x171] sm:$0xff]  ;;  %v5944_v25 = vld [vmem:[#allocation2 + $0xc2] sm:$0xff] }
  0x4d   : > { %4666 = vmatprep.mubr.msk.f32.mxu1 %vm178_vm1, %v5783_v49  ;;  %4863 = vmatprep.mubr.msk.f32.mxu0 %vm178_vm1, %v5783_v49  ;;  %6755 = vst [vmem:[#allocation23_spill] sm:$0xff] %v5940_v22  ;;  %v5942_v23 = vld [vmem:[#allocation2 + $0xb2] sm:$0xff]  ;;  %v299_v24 = vld [vmem:[#allocation2] sm:$0xff]  ;;  %v300_v26 = vld [vmem:[#allocation2 + $0x8] sm:$0xff] }
  0x4e   : > { %v5953_v27 = vld [vmem:[#allocation2 + $0xca] sm:$0xff]  ;;  %v5955_v28 = vld [vmem:[#allocation2 + $0x18] sm:$0xff]  ;;  %v5971_v31 = vld [vmem:[#allocation2 + $0x20] sm:$0xff] }
  0x4f   : > { %6756 = vst [vmem:[#allocation24_spill] sm:$0xff] %v5955_v28  ;;  %v5957_v29 = vld [vmem:[#allocation2 + $0xda] sm:$0xff]  ;;  %v5965_v30 = vld [vmem:[%s6690_s1 + $0xc] sm:$0xf]  ;;  %6757 = vst [vmem:[#allocation25_spill] sm:$0xff] %v5971_v31 }
  0x50   : > { %4667 = vmatmul.mubr.msk.f32.gmra.mrb[12].mxu1 %vm178_vm1, %v5793_v50  ;;  %4864 = vmatmul.mubr.msk.f32.gmra.mrb[10].mxu0 %vm178_vm1, %v5793_v50  ;;  %v5977_v38 = vld [vmem:[#allocation2 + $0x30] sm:$0xff]  ;;  %v5993_v40 = vld [vmem:[#allocation2 + $0xfa] sm:$0xff]  ;;  %v5995_v42 = vld [vmem:[#allocation2 + $0x48] sm:$0xff] }
  0x51   : > { %4669 = vmatprep.mubr.msk.f32.mxu1 %vm178_vm1, %v5795_v51  ;;  %4866 = vmatprep.mubr.msk.f32.mxu0 %vm178_vm1, %v5795_v51  ;;  %6758 = vst [vmem:[#allocation26_spill] sm:$0xff] %v5977_v38  ;;  %v5979_v39 = vld [vmem:[#allocation2 + $0xf2] sm:$0xff]  ;;  %6760 = vst [vmem:[#allocation28_spill] sm:$0xff] %v5995_v42  ;;  %v5997_v44 = vld [vmem:[#allocation2 + $0x10a] sm:$0xff] }
  0x52   : > { %v6007_v45 = vld [vmem:[#allocation2 + $0x50] sm:$0xff]  ;;  %v6011_v47 = vld [vmem:[#allocation2 + $0x60] sm:$0xff]  ;;  %v6023_v58 = vld [vmem:[#allocation2 + $0x68] sm:$0xff] }
  0x53   : > { %6761 = vst [vmem:[#allocation29_spill] sm:$0xff] %v6007_v45  ;;  %v6009_v46 = vld [vmem:[#allocation2 + $0x112] sm:$0xff]  ;;  %6762 = vst [vmem:[#allocation30_spill] sm:$0xff] %v6011_v47  ;;  %v6013_v57 = vld [vmem:[#allocation2 + $0x122] sm:$0xff] }
  0x54   : > { %4670 = vmatmul.mubr.msk.f32.gmra.mrb[14].mxu1 %vm178_vm1, %v5805_v52  ;;  %4867 = vmatmul.mubr.msk.f32.gmra.mrb[12].mxu0 %vm178_vm1, %v5805_v52  ;;  %6763 = vst [vmem:[#allocation31_spill] sm:$0xff] %v6023_v58 }
  0x55   : > { %4672 = vmatprep.mubr.msk.f32.mxu1 %vm178_vm1, %v5807_v53  ;;  %4869 = vmatprep.mubr.msk.f32.mxu0 %vm178_vm1, %v5807_v53 }
  0x58   : > { %4673 = vmatmul.mubr.msk.f32.gmra.mrb[16].mxu1 %vm178_vm1, %v5817_v54  ;;  %4870 = vmatmul.mubr.msk.f32.gmra.mrb[14].mxu0 %vm178_vm1, %v5817_v54  ;;  %v6101_v54 = vld [vmem:[#allocation2 + $0xe0] sm:$0xff] }
  0x59   : > { %4675 = vmatprep.mubr.msk.f32.mxu1 %vm178_vm1, %v5821_v56  ;;  %4898 = vmatprep.mubr.msk.f32.mxu0 %vm178_vm1, %v5819_v55  ;;  %v6089_v56 = vld [vmem:[#allocation2 + $0x18a] sm:$0xff] }
  0x5a   : > { %6771 = vst [vmem:[#allocation39_spill] sm:$0xff] %v6089_v56 }
  0x5c   : > { %4676 = vmatmul.mubr.msk.f32.gmra.mrb[18].mxu1 %vm178_vm1, %v5835_v59  ;;  %4899 = vmatmul.mubr.msk.f32.vlgmr.msra.gmra.mrb[0].mxu0 %vm178_vm1, %v5837_v60  ;;  %v6077_v59 = vld [vmem:[#allocation2 + $0x182] sm:$0xff] }
  0x5d   : > { %4947 = vmatpush3.msk.msra.mxu0 %vm462_vm0, %v5717_v33  ;;  %4678 = vmatprep.mubr.msk.f32.mxu1 %vm178_vm1, %v5839_v61  ;;  %v5973_v33 = vld [vmem:[#allocation2 + $0xe2] sm:$0xff]  ;;  %6770 = vst [vmem:[#allocation38_spill] sm:$0xff] %v6077_v59 }
  0x5e   : > { %4901 = vmatprep.mubr.msk.f32.mxu0 %vm178_vm1, %v5841_v62  ;;  %4996 = vmatprep.subr.msk.mxu0 %vm462_vm0, %v5846_v63  ;;  %v6075_v61 = vld [vmem:[#allocation2 + $0xc0] sm:$0xff] }
  0x60   : > { %4679 = vmatmul.mubr.msk.f32.gmra.mrb[20].mxu1 %vm178_vm1, %v5856_v0  ;;  %4902 = vmatmul.mubr.msk.f32.gmra.mrb[2].mxu0 %vm178_vm1, %v5858_v1  ;;  %v6073_v0 = vld [vmem:[#allocation2 + $0x172] sm:$0xff] }
  0x61   : > { %4681 = vmatprep.mubr.msk.f32.mxu1 %vm178_vm1, %v5862_v3  ;;  %4904 = vmatprep.mubr.msk.f32.mxu0 %vm178_vm1, %v5864_v4  ;;  %v6071_v3 = vld [vmem:[#allocation2 + $0xb0] sm:$0xff]  ;;  %6769 = vst [vmem:[#allocation37_spill] sm:$0xff] %v6073_v0 }
  0x62   : > { %6768 = vst [vmem:[#allocation36_spill] sm:$0xff] %v6071_v3 }
  0x64   : > { %4682 = vmatmul.mubr.msk.f32.gmra.mrb[22].mxu1 %vm178_vm1, %v5876_v5  ;;  %4905 = vmatmul.mubr.msk.f32.gmra.mrb[4].mxu0 %vm178_vm1, %v5878_v6  ;;  %v6061_v5 = vld [vmem:[#allocation2 + $0x16a] sm:$0xff] }
  0x65   : > { %4684 = vmatprep.mubr.msk.f32.mxu1 %vm178_vm1, %v5880_v7  ;;  %4907 = vmatprep.mubr.msk.f32.mxu0 %vm178_vm1, %v5882_v9  ;;  %v6059_v7 = vld [vmem:[#allocation2 + $0xa8] sm:$0xff] }
  0x68   : > { %4685 = vmatmul.mubr.msk.f32.gmra.mrb[24].mxu1 %vm178_vm1, %v5892_v10  ;;  %4908 = vmatmul.mubr.msk.f32.gmra.mrb[6].mxu0 %vm178_vm1, %v5894_v11  ;;  %v6057_v10 = vld [vmem:[#allocation2 + $0x15a] sm:$0xff] }
  0x69   : > { %4687 = vmatprep.mubr.msk.f32.mxu1 %vm178_vm1, %v5896_v12  ;;  %4910 = vmatprep.mubr.msk.f32.mxu0 %vm178_vm1, %v5898_v13  ;;  %v6055_v12 = vld [vmem:[#allocation2 + $0x98] sm:$0xff] }
  0x6a   : > { %6767 = vst [vmem:[#allocation35_spill] sm:$0xff] %v6055_v12 }
  0x6c   : > { %4688 = vmatmul.mubr.msk.f32.gmra.mrb[26].mxu1 %vm178_vm1, %v5908_v14  ;;  %4911 = vmatmul.mubr.msk.f32.gmra.mrb[8].mxu0 %vm178_vm1, %v5910_v15  ;;  %v6045_v14 = vld [vmem:[#allocation2 + $0x152] sm:$0xff] }
  0x6d   : > { %4690 = vmatprep.mubr.msk.f32.mxu1 %vm178_vm1, %v5912_v16  ;;  %4913 = vmatprep.mubr.msk.f32.mxu0 %vm178_vm1, %v5914_v17  ;;  %v6043_v16 = vld [vmem:[#allocation2 + $0x90] sm:$0xff] }
  0x6e   : > { %6766 = vst [vmem:[#allocation34_spill] sm:$0xff] %v6043_v16 }
  0x70   : > { %4691 = vmatmul.mubr.msk.f32.gmra.mrb[28].mxu1 %vm178_vm1, %v5924_v18  ;;  %4914 = vmatmul.mubr.msk.f32.gmra.mrb[10].mxu0 %vm178_vm1, %v5926_v19  ;;  %v6041_v18 = vld [vmem:[#allocation2 + $0x142] sm:$0xff] }
  0x71   : > { %4693 = vmatprep.mubr.msk.f32.mxu1 %vm178_vm1, %v5928_v20  ;;  %4916 = vmatprep.mubr.msk.f32.mxu0 %vm178_vm1, %v5930_v21  ;;  %v6039_v20 = vld [vmem:[#allocation2 + $0x80] sm:$0xff] }
  0x72   : > { %6765 = vst [vmem:[#allocation33_spill] sm:$0xff] %v6039_v20 }
  0x74   : > { %4694 = vmatmul.mubr.msk.f32.gmra.mrb[30].mxu1 %vm178_vm1, %v5940_v22  ;;  %4917 = vmatmul.mubr.msk.f32.gmra.mrb[12].mxu0 %vm178_vm1, %v5942_v23  ;;  %v6029_v22 = vld [vmem:[#allocation2 + $0x13a] sm:$0xff] }
  0x75   : > { %4698 = vmatprep.mubr.msk.f32.mxu1 %vm178_vm1, %v299_v24  ;;  %4919 = vmatprep.mubr.msk.f32.mxu0 %vm178_vm1, %v5944_v25  ;;  %v6025_v24 = vld [vmem:[#allocation2 + $0x12a] sm:$0xff] }
  0x78   : > { %4699 = vmatmul.mubr.msk.f32.vlgmr.msra.gmra.mrb[0].mxu1 %vm178_vm1, %v300_v26  ;;  %4920 = vmatmul.mubr.msk.f32.gmra.mrb[14].mxu0 %vm178_vm1, %v5953_v27  ;;  %v6027_v26 = vld [vmem:[#allocation2 + $0x78] sm:$0xff] }
  0x79   : > { %4701 = vmatprep.mubr.msk.f32.mxu1 %vm178_vm1, %v5955_v28  ;;  %4922 = vmatprep.mubr.msk.f32.mxu0 %vm178_vm1, %v5957_v29  ;;  %6764 = vst [vmem:[#allocation32_spill] sm:$0xff] %v6027_v26  ;;  %v6091_v28 = vld [vmem:[#allocation2 + $0xd8] sm:$0xff] }
  0x7a   : > { %4747 = vmatpush3.msk.msra.mxu1 %vm462_vm0, %v5662_v8  ;;  %v5991_v8 = vld [vmem:[#allocation2 + $0x38] sm:$0xff] }
  0x7b   : > { %4796 = vmatprep.subr.msk.mxu1 %vm462_vm0, %v5965_v30  ;;  %6759 = vst [vmem:[#allocation27_spill] sm:$0xff] %v5991_v8 }
  0x7c   : > { %4702 = vmatmul.mubr.msk.f32.gmra.mrb[2].mxu1 %vm178_vm1, %v5971_v31  ;;  %4923 = vmatmul.mubr.msk.f32.gmra.mrb[16].mxu0 %vm178_vm1, %v5973_v33  ;;  %v6087_v31 = vld [vmem:[#allocation2 + $0xc8] sm:$0xff] }
  0x7d   : > { %4704 = vmatprep.mubr.msk.f32.mxu1 %vm178_vm1, %v5977_v38  ;;  %4925 = vmatprep.mubr.msk.f32.mxu0 %vm178_vm1, %v5979_v39 }
  0x80   : > { %4705 = vmatmul.mubr.msk.f32.gmra.mrb[4].mxu1 %vm178_vm1, %v5991_v8  ;;  %4926 = vmatmul.mubr.msk.f32.gmra.mrb[18].mxu0 %vm178_vm1, %v5993_v40 }
  0x81   : > { %4707 = vmatprep.mubr.msk.f32.mxu1 %vm178_vm1, %v5995_v42  ;;  %4928 = vmatprep.mubr.msk.f32.mxu0 %vm178_vm1, %v5997_v44 }
  0x84   : > { %4708 = vmatmul.mubr.msk.f32.gmra.mrb[6].mxu1 %vm178_vm1, %v6007_v45  ;;  %4929 = vmatmul.mubr.msk.f32.gmra.mrb[20].mxu0 %vm178_vm1, %v6009_v46 }
  0x85   : > { %4710 = vmatprep.mubr.msk.f32.mxu1 %vm178_vm1, %v6011_v47  ;;  %4931 = vmatprep.mubr.msk.f32.mxu0 %vm178_vm1, %v6013_v57 }
  0x88   : > { %4711 = vmatmul.mubr.msk.f32.gmra.mrb[8].mxu1 %vm178_vm1, %v6023_v58  ;;  %4932 = vmatmul.mubr.msk.f32.gmra.mrb[22].mxu0 %vm178_vm1, %v6025_v24 }
  0x89   : > { %4713 = vmatprep.mubr.msk.f32.mxu1 %vm178_vm1, %v6027_v26  ;;  %4934 = vmatprep.mubr.msk.f32.mxu0 %vm178_vm1, %v6029_v22 }
  0x8c   : > { %4714 = vmatmul.mubr.msk.f32.gmra.mrb[10].mxu1 %vm178_vm1, %v6039_v20  ;;  %4935 = vmatmul.mubr.msk.f32.gmra.mrb[24].mxu0 %vm178_vm1, %v6041_v18 }
  0x8d   : > { %4716 = vmatprep.mubr.msk.f32.mxu1 %vm178_vm1, %v6043_v16  ;;  %4937 = vmatprep.mubr.msk.f32.mxu0 %vm178_vm1, %v6045_v14 }
  0x90   : > { %4717 = vmatmul.mubr.msk.f32.gmra.mrb[12].mxu1 %vm178_vm1, %v6055_v12  ;;  %4938 = vmatmul.mubr.msk.f32.gmra.mrb[26].mxu0 %vm178_vm1, %v6057_v10 }
  0x91   : > { %4719 = vmatprep.mubr.msk.f32.mxu1 %vm178_vm1, %v6059_v7  ;;  %4940 = vmatprep.mubr.msk.f32.mxu0 %vm178_vm1, %v6061_v5 }
  0x94   : > { %4720 = vmatmul.mubr.msk.f32.gmra.mrb[14].mxu1 %vm178_vm1, %v6071_v3  ;;  %4941 = vmatmul.mubr.msk.f32.gmra.mrb[28].mxu0 %vm178_vm1, %v6073_v0  ;;  %v6108_v0 = vld [vmem:[%s6690_s1 + $0x20] sm:$0xf] }
  0x95   : > { %4722 = vmatprep.mubr.msk.f32.mxu1 %vm178_vm1, %v6075_v61  ;;  %4943 = vmatprep.mubr.msk.f32.mxu0 %vm178_vm1, %v6077_v59  ;;  %v6103_v59 = vld [vmem:[#allocation2 + $0xf0] sm:$0xff] }
  0x98   : > { %4723 = vmatmul.mubr.msk.f32.gmra.mrb[16].mxu1 %vm178_vm1, %v6087_v31  ;;  %4944 = vmatmul.mubr.msk.f32.gmra.mrb[30].mxu0 %vm178_vm1, %v6089_v56  ;;  %v6118_v56 = vld [vmem:[#allocation2 + $0xf8] sm:$0xff] }
  0x99   : > { %4725 = vmatprep.mubr.msk.f32.mxu1 %vm178_vm1, %v6091_v28  ;;  %4948 = vmatprep.mubr.msk.f32.mxu0 %vm178_vm1, %v5977_v38  ;;  %v6122_v38 = vld [vmem:[#allocation2 + $0x108] sm:$0xff] }
  0x9c   : > { %4726 = vmatmul.mubr.msk.f32.gmra.mrb[18].mxu1 %vm178_vm1, %v6101_v54  ;;  %4949 = vmatmul.mubr.msk.f32.vlgmr.msra.gmra.mrb[0].mxu0 %vm178_vm1, %v5991_v8  ;;  %v6148_v8 = vld [vmem:[#allocation2 + $0x138] sm:$0xff] }
  0x9d   : > { %4997 = vmatpush3.msk.msra.mxu0 %vm462_vm0, %v5846_v63  ;;  %4728 = vmatprep.mubr.msk.f32.mxu1 %vm178_vm1, %v6103_v59  ;;  %v6134_v63 = vld [vmem:[#allocation2 + $0x110] sm:$0xff] }
  0x9e   : > { %4951 = vmatprep.mubr.msk.f32.mxu0 %vm178_vm1, %v5995_v42  ;;  %5046 = vmatprep.subr.msk.mxu0 %vm462_vm0, %v6108_v0  ;;  %v6136_v42 = vld [vmem:[#allocation2 + $0x120] sm:$0xff] }
  0xa0   : > { %4729 = vmatmul.mubr.msk.f32.gmra.mrb[20].mxu1 %vm178_vm1, %v6118_v56  ;;  %4952 = vmatmul.mubr.msk.f32.gmra.mrb[2].mxu0 %vm178_vm1, %v6007_v45  ;;  %v6146_v45 = vld [vmem:[#allocation2 + $0x128] sm:$0xff] }
  0xa1   : > { %4731 = vmatprep.mubr.msk.f32.mxu1 %vm178_vm1, %v6122_v38  ;;  %4954 = vmatprep.mubr.msk.f32.mxu0 %vm178_vm1, %v6011_v47  ;;  %v6160_v47 = vld [vmem:[#allocation2 + $0x150] sm:$0xff] }
  0xa4   : > { %4732 = vmatmul.mubr.msk.f32.gmra.mrb[22].mxu1 %vm178_vm1, %v6134_v63  ;;  %4955 = vmatmul.mubr.msk.f32.gmra.mrb[4].mxu0 %vm178_vm1, %v6023_v58  ;;  %v6158_v58 = vld [vmem:[#allocation2 + $0x140] sm:$0xff] }
  0xa5   : > { %4734 = vmatprep.mubr.msk.f32.mxu1 %vm178_vm1, %v6136_v42  ;;  %4957 = vmatprep.mubr.msk.f32.mxu0 %vm178_vm1, %v6027_v26  ;;  %v6172_v26 = vld [vmem:[#allocation2 + $0x168] sm:$0xff] }
  0xa8   : > { %4735 = vmatmul.mubr.msk.f32.gmra.mrb[24].mxu1 %vm178_vm1, %v6146_v45  ;;  %4958 = vmatmul.mubr.msk.f32.gmra.mrb[6].mxu0 %vm178_vm1, %v6039_v20  ;;  %v6170_v20 = vld [vmem:[#allocation2 + $0x158] sm:$0xff] }
  0xa9   : > { %4737 = vmatprep.mubr.msk.f32.mxu1 %vm178_vm1, %v6148_v8  ;;  %4960 = vmatprep.mubr.msk.f32.mxu0 %vm178_vm1, %v6043_v16  ;;  %v1015_v16 = vld [vmem:[#allocation2 + $0x2] sm:$0xff] }
  0xac   : > { %4738 = vmatmul.mubr.msk.f32.gmra.mrb[26].mxu1 %vm178_vm1, %v6158_v58  ;;  %4961 = vmatmul.mubr.msk.f32.gmra.mrb[8].mxu0 %vm178_vm1, %v6055_v12  ;;  %v6182_v12 = vld [vmem:[#allocation2 + $0x170] sm:$0xff] }
  0xad   : > { %4740 = vmatprep.mubr.msk.f32.mxu1 %vm178_vm1, %v6160_v47  ;;  %4963 = vmatprep.mubr.msk.f32.mxu0 %vm178_vm1, %v6059_v7 }
  0xb0   : > { %4741 = vmatmul.mubr.msk.f32.gmra.mrb[28].mxu1 %vm178_vm1, %v6170_v20  ;;  %4964 = vmatmul.mubr.msk.f32.gmra.mrb[10].mxu0 %vm178_vm1, %v6071_v3  ;;  %v1016_v3 = vld [vmem:[#allocation2 + $0xa] sm:$0xff] }
  0xb1   : > { %4743 = vmatprep.mubr.msk.f32.mxu1 %vm178_vm1, %v6172_v26  ;;  %4966 = vmatprep.mubr.msk.f32.mxu0 %vm178_vm1, %v6075_v61 }
  0xb4   : > { %4744 = vmatmul.mubr.msk.f32.gmra.mrb[30].mxu1 %vm178_vm1, %v6182_v12  ;;  %4967 = vmatmul.mubr.msk.f32.gmra.mrb[12].mxu0 %vm178_vm1, %v6087_v31 }
  0xb5   : > { %4748 = vmatprep.mubr.msk.f32.mxu1 %vm178_vm1, %v1015_v16  ;;  %4969 = vmatprep.mubr.msk.f32.mxu0 %vm178_vm1, %v6091_v28  ;;  %v2607_v16 = vld [vmem:[#allocation2 + $0x1a0] sm:$0xff] }
  0xb8   : > { %4749 = vmatmul.mubr.msk.f32.vlgmr.msra.gmra.mrb[0].mxu1 %vm178_vm1, %v1016_v3  ;;  %4970 = vmatmul.mubr.msk.f32.gmra.mrb[14].mxu0 %vm178_vm1, %v6101_v54  ;;  %v2606_v3 = vld [vmem:[#allocation2 + $0x198] sm:$0xff] }
  0xb9   : > { %4751 = vmatprep.mubr.msk.f32.mxu1 %vm178_vm1, %v5819_v55  ;;  %4972 = vmatprep.mubr.msk.f32.mxu0 %vm178_vm1, %v6103_v59  ;;  %v6242_v55 = vld [vmem:[#allocation2 + $0x180] sm:$0xff] }
  0xba   : > { %4797 = vmatpush3.msk.msra.mxu1 %vm462_vm0, %v5965_v30  ;;  %v6786_v30 = vld [vmem:[#allocation30_spill] sm:$0xff] }
  0xbb   : > { %5096 = vmatprep.subr.msk.mxu1 %vm462_vm0, %v5630_v2 }
  0xbc   : > { %4752 = vmatmul.mubr.msk.f32.gmra.mrb[2].mxu1 %vm178_vm1, %v5837_v60  ;;  %4973 = vmatmul.mubr.msk.f32.gmra.mrb[16].mxu0 %vm178_vm1, %v6118_v56  ;;  %v6252_v60 = vld [vmem:[#allocation2 + $0x188] sm:$0xff] }
  0xbd   : > { %4754 = vmatprep.mubr.msk.f32.mxu1 %vm178_vm1, %v5841_v62  ;;  %4975 = vmatprep.mubr.msk.f32.mxu0 %vm178_vm1, %v6122_v38 }
  0xc0   : > { %4755 = vmatmul.mubr.msk.f32.gmra.mrb[4].mxu1 %vm178_vm1, %v5858_v1  ;;  %4976 = vmatmul.mubr.msk.f32.gmra.mrb[18].mxu0 %vm178_vm1, %v6134_v63 }
  0xc1   : > { %4757 = vmatprep.mubr.msk.f32.mxu1 %vm178_vm1, %v5864_v4  ;;  %4978 = vmatprep.mubr.msk.f32.mxu0 %vm178_vm1, %v6136_v42 }
  0xc4   : > { %4758 = vmatmul.mubr.msk.f32.gmra.mrb[6].mxu1 %vm178_vm1, %v5878_v6  ;;  %4979 = vmatmul.mubr.msk.f32.gmra.mrb[20].mxu0 %vm178_vm1, %v6146_v45 }
  0xc5   : > { %4760 = vmatprep.mubr.msk.f32.mxu1 %vm178_vm1, %v5882_v9  ;;  %4981 = vmatprep.mubr.msk.f32.mxu0 %vm178_vm1, %v6148_v8 }
  0xc8   : > { %4761 = vmatmul.mubr.msk.f32.gmra.mrb[8].mxu1 %vm178_vm1, %v5894_v11  ;;  %4982 = vmatmul.mubr.msk.f32.gmra.mrb[22].mxu0 %vm178_vm1, %v6158_v58 }
  0xc9   : > { %4763 = vmatprep.mubr.msk.f32.mxu1 %vm178_vm1, %v5898_v13  ;;  %4984 = vmatprep.mubr.msk.f32.mxu0 %vm178_vm1, %v6160_v47 }
  0xcc   : > { %4764 = vmatmul.mubr.msk.f32.gmra.mrb[10].mxu1 %vm178_vm1, %v5910_v15  ;;  %4985 = vmatmul.mubr.msk.f32.gmra.mrb[24].mxu0 %vm178_vm1, %v6170_v20 }
  0xcd   : > { %4766 = vmatprep.mubr.msk.f32.mxu1 %vm178_vm1, %v5914_v17  ;;  %4987 = vmatprep.mubr.msk.f32.mxu0 %vm178_vm1, %v6172_v26 }
  0xd0   : > { %4767 = vmatmul.mubr.msk.f32.gmra.mrb[12].mxu1 %vm178_vm1, %v5926_v19  ;;  %4988 = vmatmul.mubr.msk.f32.gmra.mrb[26].mxu0 %vm178_vm1, %v6182_v12 }
  0xd1   : > { %4769 = vmatprep.mubr.msk.f32.mxu1 %vm178_vm1, %v5930_v21  ;;  %4990 = vmatprep.mubr.msk.f32.mxu0 %vm178_vm1, %v6242_v55 }
  0xd4   : > { %4770 = vmatmul.mubr.msk.f32.gmra.mrb[14].mxu1 %vm178_vm1, %v5942_v23  ;;  %4991 = vmatmul.mubr.msk.f32.gmra.mrb[28].mxu0 %vm178_vm1, %v6252_v60 }
  0xd5   : > { %4772 = vmatprep.mubr.msk.f32.mxu1 %vm178_vm1, %v5944_v25  ;;  %4993 = vmatprep.mubr.msk.f32.mxu0 %vm178_vm1, %v2606_v3  ;;  %v6788_v3 = vld [vmem:[#allocation31_spill] sm:$0xff] }
  0xd8   : > { %4773 = vmatmul.mubr.msk.f32.gmra.mrb[16].mxu1 %vm178_vm1, %v5953_v27  ;;  %4994 = vmatmul.mubr.msk.f32.gmra.mrb[30].mxu0 %vm178_vm1, %v2607_v16  ;;  %v6789_v16 = vld [vmem:[#allocation17_spill] sm:$0xff] }
  0xd9   : > { %4775 = vmatprep.mubr.msk.f32.mxu1 %vm178_vm1, %v5957_v29  ;;  %4998 = vmatprep.mubr.msk.f32.mxu0 %vm178_vm1, %v5707_v32  ;;  %v6772_v32 = vld [vmem:[#allocation37_spill] sm:$0xff] }
  0xdc   : > { %4776 = vmatmul.mubr.msk.f32.gmra.mrb[18].mxu1 %vm178_vm1, %v5973_v33  ;;  %4999 = vmatmul.mubr.msk.f32.vlgmr.msra.gmra.mrb[0].mxu0 %vm178_vm1, %v5725_v34  ;;  %v6773_v34 = vld [vmem:[#allocation9_spill] sm:$0xff] }
  0xdd   : > { %5047 = vmatpush3.msk.msra.mxu0 %vm462_vm0, %v6108_v0  ;;  %4778 = vmatprep.mubr.msk.f32.mxu1 %vm178_vm1, %v5979_v39  ;;  %v6785_v0 = vld [vmem:[#allocation15_spill] sm:$0xff] }
  0xde   : > { %5001 = vmatprep.mubr.msk.f32.mxu0 %vm178_vm1, %v5729_v35  ;;  %v6774_v35 = vld [vmem:[#allocation24_spill] sm:$0xff] }
  0xe0   : > { %4779 = vmatmul.mubr.msk.f32.gmra.mrb[20].mxu1 %vm178_vm1, %v5993_v40  ;;  %5002 = vmatmul.mubr.msk.f32.gmra.mrb[2].mxu0 %vm178_vm1, %v5741_v36  ;;  %v6775_v36 = vld [vmem:[#allocation10_spill] sm:$0xff] }
  0xe1   : > { %4781 = vmatprep.mubr.msk.f32.mxu1 %vm178_vm1, %v5997_v44  ;;  %5004 = vmatprep.mubr.msk.f32.mxu0 %vm178_vm1, %v5743_v37  ;;  %v6776_v37 = vld [vmem:[#allocation25_spill] sm:$0xff] }
  0xe4   : > { %4782 = vmatmul.mubr.msk.f32.gmra.mrb[22].mxu1 %vm178_vm1, %v6009_v46  ;;  %5005 = vmatmul.mubr.msk.f32.gmra.mrb[4].mxu0 %vm178_vm1, %v5757_v41  ;;  %v6777_v41 = vld [vmem:[#allocation11_spill] sm:$0xff] }
  0xe5   : > { %4784 = vmatprep.mubr.msk.f32.mxu1 %vm178_vm1, %v6013_v57  ;;  %5007 = vmatprep.mubr.msk.f32.mxu0 %vm178_vm1, %v5762_v43  ;;  %v6778_v43 = vld [vmem:[#allocation26_spill] sm:$0xff] }
  0xe8   : > { %4785 = vmatmul.mubr.msk.f32.gmra.mrb[24].mxu1 %vm178_vm1, %v6025_v24  ;;  %5008 = vmatmul.mubr.msk.f32.gmra.mrb[6].mxu0 %vm178_vm1, %v5780_v48  ;;  %v6779_v48 = vld [vmem:[#allocation12_spill] sm:$0xff] }
  0xe9   : > { %4787 = vmatprep.mubr.msk.f32.mxu1 %vm178_vm1, %v6029_v22  ;;  %5010 = vmatprep.mubr.msk.f32.mxu0 %vm178_vm1, %v5783_v49  ;;  %v6780_v49 = vld [vmem:[#allocation27_spill] sm:$0xff] }
  0xec   : > { %4788 = vmatmul.mubr.msk.f32.gmra.mrb[26].mxu1 %vm178_vm1, %v6041_v18  ;;  %5011 = vmatmul.mubr.msk.f32.gmra.mrb[8].mxu0 %vm178_vm1, %v5793_v50  ;;  %v6781_v50 = vld [vmem:[#allocation13_spill] sm:$0xff] }
  0xed   : > { %4790 = vmatprep.mubr.msk.f32.mxu1 %vm178_vm1, %v6045_v14  ;;  %5013 = vmatprep.mubr.msk.f32.mxu0 %vm178_vm1, %v5795_v51  ;;  %v6782_v51 = vld [vmem:[#allocation28_spill] sm:$0xff] }
  0xf0   : > { %4791 = vmatmul.mubr.msk.f32.gmra.mrb[28].mxu1 %vm178_vm1, %v6057_v10  ;;  %5014 = vmatmul.mubr.msk.f32.gmra.mrb[10].mxu0 %vm178_vm1, %v5805_v52  ;;  %v6783_v52 = vld [vmem:[#allocation14_spill] sm:$0xff] }
  0xf1   : > { %4793 = vmatprep.mubr.msk.f32.mxu1 %vm178_vm1, %v6061_v5  ;;  %5016 = vmatprep.mubr.msk.f32.mxu0 %vm178_vm1, %v5807_v53  ;;  %v6784_v53 = vld [vmem:[#allocation29_spill] sm:$0xff] }
  0xf4   : > { %4794 = vmatmul.mubr.msk.f32.gmra.mrb[30].mxu1 %vm178_vm1, %v6772_v32  ;;  %5017 = vmatmul.mubr.msk.f32.gmra.mrb[12].mxu0 %vm178_vm1, %v6773_v34  ;;  %v6790_v34 = vld [vmem:[#allocation32_spill] sm:$0xff] }
  0xf5   : > { %4798 = vmatprep.mubr.msk.f32.mxu1 %vm178_vm1, %v6774_v35  ;;  %5019 = vmatprep.mubr.msk.f32.mxu0 %vm178_vm1, %v6775_v36  ;;  %v6791_v35 = vld [vmem:[#allocation18_spill] sm:$0xff] }
  0xf8   : > { %4799 = vmatmul.mubr.msk.f32.vlgmr.msra.gmra.mrb[0].mxu1 %vm178_vm1, %v6776_v37  ;;  %5020 = vmatmul.mubr.msk.f32.gmra.mrb[14].mxu0 %vm178_vm1, %v6777_v41  ;;  %v6792_v37 = vld [vmem:[#allocation33_spill] sm:$0xff] }
  0xf9   : > { %4801 = vmatprep.mubr.msk.f32.mxu1 %vm178_vm1, %v6778_v43  ;;  %5022 = vmatprep.mubr.msk.f32.mxu0 %vm178_vm1, %v6779_v48  ;;  %v6793_v43 = vld [vmem:[#allocation19_spill] sm:$0xff] }
  0xfa   : > { %5097 = vmatpush3.msk.msra.mxu1 %vm462_vm0, %v5630_v2  ;;  %v6787_v2 = vld [vmem:[#allocation16_spill] sm:$0xff] }
  0xfc   : > { %4802 = vmatmul.mubr.msk.f32.gmra.mrb[2].mxu1 %vm178_vm1, %v6780_v49  ;;  %5023 = vmatmul.mubr.msk.f32.gmra.mrb[16].mxu0 %vm178_vm1, %v6781_v50  ;;  %v6794_v49 = vld [vmem:[#allocation34_spill] sm:$0xff] }
  0xfd   : > { %4804 = vmatprep.mubr.msk.f32.mxu1 %vm178_vm1, %v6782_v51  ;;  %5025 = vmatprep.mubr.msk.f32.mxu0 %vm178_vm1, %v6783_v52  ;;  %v6795_v51 = vld [vmem:[#allocation20_spill] sm:$0xff] }
 0x100   : > { %4805 = vmatmul.mubr.msk.f32.gmra.mrb[4].mxu1 %vm178_vm1, %v6784_v53  ;;  %5026 = vmatmul.mubr.msk.f32.gmra.mrb[18].mxu0 %vm178_vm1, %v6785_v0  ;;  %v6796_v53 = vld [vmem:[#allocation35_spill] sm:$0xff] }
 0x101   : > { %4807 = vmatprep.mubr.msk.f32.mxu1 %vm178_vm1, %v6786_v30  ;;  %5028 = vmatprep.mubr.msk.f32.mxu0 %vm178_vm1, %v6787_v2  ;;  %v6797_v30 = vld [vmem:[#allocation21_spill] sm:$0xff] }
 0x104   : > { %4808 = vmatmul.mubr.msk.f32.gmra.mrb[6].mxu1 %vm178_vm1, %v6788_v3  ;;  %5029 = vmatmul.mubr.msk.f32.gmra.mrb[20].mxu0 %vm178_vm1, %v6789_v16  ;;  %v6798_v3 = vld [vmem:[#allocation22_spill] sm:$0xff] }
 0x105   : > { %4810 = vmatprep.mubr.msk.f32.mxu1 %vm178_vm1, %v6790_v34  ;;  %5031 = vmatprep.mubr.msk.f32.mxu0 %vm178_vm1, %v6791_v35  ;;  %v6376_v34 = vld [vmem:[#allocation2 + $0x181] sm:$0xff] }
 0x108   : > { %4811 = vmatmul.mubr.msk.f32.gmra.mrb[8].mxu1 %vm178_vm1, %v6792_v37  ;;  %5032 = vmatmul.mubr.msk.f32.gmra.mrb[22].mxu0 %vm178_vm1, %v6793_v43  ;;  %v6799_v37 = vld [vmem:[#allocation36_spill] sm:$0xff] }
 0x109   : > { %4813 = vmatprep.mubr.msk.f32.mxu1 %vm178_vm1, %v6794_v49  ;;  %5034 = vmatprep.mubr.msk.f32.mxu0 %vm178_vm1, %v6795_v51  ;;  %v6800_v49 = vld [vmem:[#allocation23_spill] sm:$0xff] }
 0x10c   : > { %4814 = vmatmul.mubr.msk.f32.gmra.mrb[10].mxu1 %vm178_vm1, %v6796_v53  ;;  %5035 = vmatmul.mubr.msk.f32.gmra.mrb[24].mxu0 %vm178_vm1, %v6797_v30  ;;  %v6386_v53 = vld [vmem:[#allocation2 + $0x189] sm:$0xff] }
 0x10d   : > { %4816 = vmatprep.mubr.msk.f32.mxu1 %vm178_vm1, %v6059_v7  ;;  %5037 = vmatprep.mubr.msk.f32.mxu0 %vm178_vm1, %v6798_v3  ;;  %v2996_v7 = vld [vmem:[#allocation2 + $0x199] sm:$0xff] }
 0x110   : > { %4817 = vmatmul.mubr.msk.f32.gmra.mrb[12].mxu1 %vm178_vm1, %v6799_v37  ;;  %5038 = vmatmul.mubr.msk.f32.gmra.mrb[26].mxu0 %vm178_vm1, %v6800_v49  ;;  %v2997_v37 = vld [vmem:[#allocation2 + $0x1a1] sm:$0xff] }
 0x111   : > { %4819 = vmatprep.mubr.msk.f32.mxu1 %vm178_vm1, %v6075_v61  ;;  %5040 = vmatprep.mubr.msk.f32.mxu0 %vm178_vm1, %v6376_v34  ;;  %v3387_v61 = vld [vmem:[#allocation2 + $0x1a2] sm:$0xff] }
 0x114   : > { %4820 = vmatmul.mubr.msk.f32.gmra.mrb[14].mxu1 %vm178_vm1, %v6087_v31  ;;  %5041 = vmatmul.mubr.msk.f32.gmra.mrb[28].mxu0 %vm178_vm1, %v6386_v53 }
 0x115   : > { %4822 = vmatprep.mubr.msk.f32.mxu1 %vm178_vm1, %v6091_v28  ;;  %5043 = vmatprep.mubr.msk.f32.mxu0 %vm178_vm1, %v2996_v7 }
 0x118   : > { %4823 = vmatmul.mubr.msk.f32.gmra.mrb[16].mxu1 %vm178_vm1, %v6101_v54  ;;  %5044 = vmatmul.mubr.msk.f32.gmra.mrb[30].mxu0 %vm178_vm1, %v2997_v37  ;;  %v6801_v54 = vld [vmem:[#allocation38_spill] sm:$0xff] }
 0x119   : > { %4825 = vmatprep.mubr.msk.f32.mxu1 %vm178_vm1, %v6103_v59  ;;  %5048 = vmatprep.mubr.msk.f32.mxu0 %vm178_vm1, %v5841_v62  ;;  %v6802_v59 = vld [vmem:[#allocation39_spill] sm:$0xff] }
 0x11c   : > { %4826 = vmatmul.mubr.msk.f32.gmra.mrb[18].mxu1 %vm178_vm1, %v6118_v56  ;;  %5049 = vmatmul.mubr.msk.f32.vlgmr.msra.gmra.mrb[0].mxu0 %vm178_vm1, %v5858_v1  ;;  %v3386_v56 = vld [vmem:[#allocation2 + $0x19a] sm:$0xff] }
 0x11d   : > { %4828 = vmatprep.mubr.msk.f32.mxu1 %vm178_vm1, %v6122_v38  ;;  %5051 = vmatprep.mubr.msk.f32.mxu0 %vm178_vm1, %v5864_v4 }
 0x120   : > { %4829 = vmatmul.mubr.msk.f32.gmra.mrb[20].mxu1 %vm178_vm1, %v6134_v63  ;;  %5052 = vmatmul.mubr.msk.f32.gmra.mrb[2].mxu0 %vm178_vm1, %v5878_v6 }
 0x121   : > { %4831 = vmatprep.mubr.msk.f32.mxu1 %vm178_vm1, %v6136_v42  ;;  %5054 = vmatprep.mubr.msk.f32.mxu0 %vm178_vm1, %v5882_v9 }
 0x124   : > { %4832 = vmatmul.mubr.msk.f32.gmra.mrb[22].mxu1 %vm178_vm1, %v6146_v45  ;;  %5055 = vmatmul.mubr.msk.f32.gmra.mrb[4].mxu0 %vm178_vm1, %v5894_v11 }
 0x125   : > { %4834 = vmatprep.mubr.msk.f32.mxu1 %vm178_vm1, %v6148_v8  ;;  %5057 = vmatprep.mubr.msk.f32.mxu0 %vm178_vm1, %v5898_v13 }
 0x128   : > { %4835 = vmatmul.mubr.msk.f32.gmra.mrb[24].mxu1 %vm178_vm1, %v6158_v58  ;;  %5058 = vmatmul.mubr.msk.f32.gmra.mrb[6].mxu0 %vm178_vm1, %v5910_v15 }
 0x129   : > { %4837 = vmatprep.mubr.msk.f32.mxu1 %vm178_vm1, %v6160_v47  ;;  %5060 = vmatprep.mubr.msk.f32.mxu0 %vm178_vm1, %v5914_v17 }
 0x12c   : > { %4838 = vmatmul.mubr.msk.f32.gmra.mrb[26].mxu1 %vm178_vm1, %v6170_v20  ;;  %5061 = vmatmul.mubr.msk.f32.gmra.mrb[8].mxu0 %vm178_vm1, %v5926_v19 }
 0x12d   : > { %4840 = vmatprep.mubr.msk.f32.mxu1 %vm178_vm1, %v6172_v26  ;;  %5063 = vmatprep.mubr.msk.f32.mxu0 %vm178_vm1, %v5930_v21 }
 0x130   : > { %4841 = vmatmul.mubr.msk.f32.gmra.mrb[28].mxu1 %vm178_vm1, %v6182_v12  ;;  %5064 = vmatmul.mubr.msk.f32.gmra.mrb[10].mxu0 %vm178_vm1, %v5942_v23 }
 0x131   : > { %4843 = vmatprep.mubr.msk.f32.mxu1 %vm178_vm1, %v6242_v55  ;;  %5066 = vmatprep.mubr.msk.f32.mxu0 %vm178_vm1, %v5944_v25 }
 0x134   : > { %4844 = vmatmul.mubr.msk.f32.gmra.mrb[30].mxu1 %vm178_vm1, %v6252_v60  ;;  %5067 = vmatmul.mubr.msk.f32.gmra.mrb[12].mxu0 %vm178_vm1, %v5953_v27 }
 0x135   : > { %4872 = vmatprep.mubr.msk.f32.mxu1 %vm178_vm1, %v6775_v36  ;;  %5069 = vmatprep.mubr.msk.f32.mxu0 %vm178_vm1, %v5957_v29 }
 0x138   : > { %4873 = vmatmul.mubr.msk.f32.vlgmr.msra.gmra.mrb[16].mxu1 %vm178_vm1, %v6777_v41  ;;  %5070 = vmatmul.mubr.msk.f32.gmra.mrb[14].mxu0 %vm178_vm1, %v5973_v33 }
 0x139   : > { %4875 = vmatprep.mubr.msk.f32.mxu1 %vm178_vm1, %v6779_v48  ;;  %5072 = vmatprep.mubr.msk.f32.mxu0 %vm178_vm1, %v5979_v39 }
 0x13c   : > { %4876 = vmatmul.mubr.msk.f32.gmra.mrb[18].mxu1 %vm178_vm1, %v6781_v50  ;;  %5073 = vmatmul.mubr.msk.f32.gmra.mrb[16].mxu0 %vm178_vm1, %v5993_v40 }
 0x13d   : > { %4878 = vmatprep.mubr.msk.f32.mxu1 %vm178_vm1, %v6783_v52  ;;  %5075 = vmatprep.mubr.msk.f32.mxu0 %vm178_vm1, %v5997_v44 }
 0x140   : > { %4879 = vmatmul.mubr.msk.f32.gmra.mrb[20].mxu1 %vm178_vm1, %v6785_v0  ;;  %5076 = vmatmul.mubr.msk.f32.gmra.mrb[18].mxu0 %vm178_vm1, %v6009_v46 }
 0x141   : > { %4881 = vmatprep.mubr.msk.f32.mxu1 %vm178_vm1, %v6787_v2  ;;  %5078 = vmatprep.mubr.msk.f32.mxu0 %vm178_vm1, %v6013_v57 }
 0x144   : > { %4882 = vmatmul.mubr.msk.f32.gmra.mrb[22].mxu1 %vm178_vm1, %v6789_v16  ;;  %5079 = vmatmul.mubr.msk.f32.gmra.mrb[20].mxu0 %vm178_vm1, %v6025_v24 }
 0x145   : > { %4884 = vmatprep.mubr.msk.f32.mxu1 %vm178_vm1, %v6791_v35  ;;  %5081 = vmatprep.mubr.msk.f32.mxu0 %vm178_vm1, %v6029_v22 }
 0x148   : > { %4885 = vmatmul.mubr.msk.f32.gmra.mrb[24].mxu1 %vm178_vm1, %v6793_v43  ;;  %5082 = vmatmul.mubr.msk.f32.gmra.mrb[22].mxu0 %vm178_vm1, %v6041_v18 }
 0x149   : > { %4887 = vmatprep.mubr.msk.f32.mxu1 %vm178_vm1, %v6795_v51  ;;  %5084 = vmatprep.mubr.msk.f32.mxu0 %vm178_vm1, %v6045_v14 }
 0x14c   : > { %4888 = vmatmul.mubr.msk.f32.gmra.mrb[26].mxu1 %vm178_vm1, %v6797_v30  ;;  %5085 = vmatmul.mubr.msk.f32.gmra.mrb[24].mxu0 %vm178_vm1, %v6057_v10 }
 0x14d   : > { %4890 = vmatprep.mubr.msk.f32.mxu1 %vm178_vm1, %v6798_v3  ;;  %5087 = vmatprep.mubr.msk.f32.mxu0 %vm178_vm1, %v6061_v5 }
 0x150   : > { %4891 = vmatmul.mubr.msk.f32.gmra.mrb[28].mxu1 %vm178_vm1, %v6800_v49  ;;  %5088 = vmatmul.mubr.msk.f32.gmra.mrb[26].mxu0 %vm178_vm1, %v6772_v32 }
 0x151   : > { %4893 = vmatprep.mubr.msk.f32.mxu1 %vm178_vm1, %v6376_v34  ;;  %5090 = vmatprep.mubr.msk.f32.mxu0 %vm178_vm1, %v6801_v54 }
 0x154   : > { %4894 = vmatmul.mubr.msk.f32.gmra.mrb[30].mxu1 %vm178_vm1, %v6386_v53  ;;  %5091 = vmatmul.mubr.msk.f32.gmra.mrb[28].mxu0 %vm178_vm1, %v6802_v59 }
 0x155   : > { %5093 = vmatprep.mubr.msk.f32.mxu0 %vm178_vm1, %v3386_v56 }
 0x158   : > { %5094 = vmatmul.mubr.msk.f32.gmra.mrb[30].mxu0 %vm178_vm1, %v3387_v61 }
 0x1cb   : > { %v4800_v62 = vpop.f32.mrb[0].mxu1 }
 0x1cc   : > { %v1604_v1 = vpop.f32.mrb[1].mxu1 }
 0x1cf   : > { %v4803_v4 = vpop.f32.mrb[2].mxu1 }
 0x1d0   : > { %v1614_v5 = vpop.f32.mrb[3].mxu1 }
 0x1d3   : > { %v4806_v6 = vpop.f32.mrb[4].mxu1 }
 0x1d4   : > { %v1624_v9 = vpop.f32.mrb[5].mxu1 }
 0x1d7   : > { %v4809_v10 = vpop.f32.mrb[6].mxu1 }
 0x1d8   : > { %v1634_v11 = vpop.f32.mrb[7].mxu1 }
 0x1db   : > { %v4812_v12 = vpop.f32.mrb[8].mxu1 }
 0x1dc   : > { %v1644_v13 = vpop.f32.mrb[9].mxu1 }
 0x1df   : > { %v6520_v14 = vpop.f32.mrb[10].mxu1 }
 0x1e0   : > { %v6522_v15 = vpop.f32.mrb[11].mxu1 }
 0x1e3   : > { %v6524_v17 = vpop.f32.mrb[12].mxu1 }
 0x1e4   : > { %v6526_v18 = vpop.f32.mrb[13].mxu1 }
 0x1e7   : > { %v6528_v19 = vpop.f32.mrb[14].mxu1 }
 0x1e8   : > { %v6530_v20 = vpop.f32.mrb[15].mxu1 }
 0x1ef   : > { %v5050_v21 = vpop.f32.mrb[0].mxu0 }
 0x1f0   : > { %v5098_v22 = vadd.f32 %v5050_v21, %v4800_v62  ;;  %v3555_v23 = vpop.f32.mrb[1].mxu0 }
 0x1f1   : > { %v5099_v25 = vadd.f32 %v3555_v23, %v1604_v1 }
 0x1f2   : > { %v3748_v27 = vsel %vm3746_vm3, %v5098_v22, 0.0  ;;  %v3819_v28 = vmul.f32 %v5098_v22, %v5098_v22 }
 0x1f3   : > { %v3747_v29 = vsel %vm3746_vm3, %v5099_v25, 0.0  ;;  %v3818_v31 = vmul.f32 %v5099_v25, %v5099_v25  ;;  %v5053_v33 = vpop.f32.mrb[2].mxu0 }
 0x1f4   : > { %v3851_v38 = vsel %vm3746_vm3, %v3819_v28, 0.0  ;;  %v3749_v39 = vadd.f32 %v3748_v27, %v3747_v29  ;;  %v5100_v8 = vadd.f32 %v5053_v33, %v4803_v4  ;;  %v3565_v40 = vpop.f32.mrb[3].mxu0 }
 0x1f5   : > { %v3850_v42 = vsel %vm3746_vm3, %v3818_v31, 0.0  ;;  %v5101_v44 = vadd.f32 %v3565_v40, %v1614_v5 }
 0x1f6   : > { %v3852_v45 = vadd.f32 %v3851_v38, %v3850_v42  ;;  %v3821_v46 = vmul.f32 %v5100_v8, %v5100_v8  ;;  %v3752_v55 = vsel %vm3746_vm3, %v5100_v8, 0.0 }
 0x1f7   : > { %v3750_v47 = vsel %vm3746_vm3, %v5101_v44, 0.0  ;;  %v3820_v57 = vmul.f32 %v5101_v44, %v5101_v44  ;;  %v5056_v58 = vpop.f32.mrb[4].mxu0 }
 0x1f8   : > { %v3751_v24 = vadd.f32 %v3750_v47, %v3749_v39  ;;  %v5102_v26 = vadd.f32 %v5056_v58, %v4806_v6  ;;  %v3575_v63 = vpop.f32.mrb[5].mxu0  ;;  %v3855_v48 = vsel %vm3746_vm3, %v3821_v46, 0.0 }
 0x1f9   : > { %v3853_v60 = vsel %vm3746_vm3, %v3820_v57, 0.0  ;;  %v5103_v32 = vadd.f32 %v3575_v63, %v1624_v9 }
 0x1fa   : > { %v3854_v36 = vadd.f32 %v3853_v60, %v3852_v45  ;;  %v3753_v41 = vadd.f32 %v3752_v55, %v3751_v24  ;;  %v3823_v50 = vmul.f32 %v5102_v26, %v5102_v26  ;;  %v3756_v30 = vsel %vm3746_vm3, %v5102_v26, 0.0 }
 0x1fb   : > { %v3754_v52 = vsel %vm3746_vm3, %v5103_v32, 0.0  ;;  %v3822_v0 = vmul.f32 %v5103_v32, %v5103_v32  ;;  %v5059_v2 = vpop.f32.mrb[6].mxu0 }
 0x1fc   : > { %v3755_v16 = vadd.f32 %v3754_v52, %v3753_v41  ;;  %v3856_v35 = vadd.f32 %v3855_v48, %v3854_v36  ;;  %v5104_v43 = vadd.f32 %v5059_v2, %v4809_v10  ;;  %v3585_v51 = vpop.f32.mrb[7].mxu0  ;;  %v3859_v7 = vsel %vm3746_vm3, %v3823_v50, 0.0 }
 0x1fd   : > { %v3857_v3 = vsel %vm3746_vm3, %v3822_v0, 0.0  ;;  %v5105_v34 = vadd.f32 %v3585_v51, %v1634_v11 }
 0x1fe   : > { %v3858_v49 = vadd.f32 %v3857_v3, %v3856_v35  ;;  %v3757_v53 = vadd.f32 %v3756_v30, %v3755_v16  ;;  %v3825_v37 = vmul.f32 %v5104_v43, %v5104_v43  ;;  %v3760_v5 = vsel %vm3746_vm3, %v5104_v43, 0.0 }
 0x1ff   : > { %v3758_v54 = vsel %vm3746_vm3, %v5105_v34, 0.0  ;;  %v3824_v56 = vmul.f32 %v5105_v34, %v5105_v34  ;;  %v5062_v59 = vpop.f32.mrb[8].mxu0 }
 0x200   : > { %v3759_v61 = vadd.f32 %v3758_v54, %v3757_v53  ;;  %v3860_v62 = vadd.f32 %v3859_v7, %v3858_v49  ;;  %v5106_v1 = vadd.f32 %v5062_v59, %v4812_v12  ;;  %v3595_v4 = vpop.f32.mrb[9].mxu0  ;;  %v3863_v21 = vsel %vm3746_vm3, %v3825_v37, 0.0 }
 0x201   : > { %v3861_v6 = vsel %vm3746_vm3, %v3824_v56, 0.0  ;;  %v5107_v9 = vadd.f32 %v3595_v4, %v1644_v13 }
 0x202   : > { %v3862_v10 = vadd.f32 %v3861_v6, %v3860_v62  ;;  %v3761_v11 = vadd.f32 %v3760_v5, %v3759_v61  ;;  %v3827_v22 = vmul.f32 %v5106_v1, %v5106_v1  ;;  %v3764_v33 = vsel %vm3746_vm3, %v5106_v1, 0.0 }
 0x203   : > { %v3762_v23 = vsel %vm3746_vm3, %v5107_v9, 0.0  ;;  %v3826_v25 = vmul.f32 %v5107_v9, %v5107_v9  ;;  %v5065_v27 = vpop.f32.mrb[10].mxu0 }
 0x204   : > { %v3763_v28 = vadd.f32 %v3762_v23, %v3761_v11  ;;  %v3864_v29 = vadd.f32 %v3863_v21, %v3862_v10  ;;  %v5108_v31 = vadd.f32 %v5065_v27, %v6520_v14  ;;  %v3605_v12 = vpop.f32.mrb[11].mxu0  ;;  %v3867_v40 = vsel %vm3746_vm3, %v3827_v22, 0.0 }
 0x205   : > { %v3865_v38 = vsel %vm3746_vm3, %v3826_v25, 0.0  ;;  %v5109_v13 = vadd.f32 %v3605_v12, %v6522_v15 }
 0x206   : > { %v3866_v39 = vadd.f32 %v3865_v38, %v3864_v29  ;;  %v3765_v8 = vadd.f32 %v3764_v33, %v3763_v28  ;;  %v3829_v42 = vmul.f32 %v5108_v31, %v5108_v31  ;;  %v3768_v24 = vsel %vm3746_vm3, %v5108_v31, 0.0 }
 0x207   : > { %v3766_v44 = vsel %vm3746_vm3, %v5109_v13, 0.0  ;;  %v3828_v45 = vmul.f32 %v5109_v13, %v5109_v13  ;;  %v5068_v46 = vpop.f32.mrb[12].mxu0 }
 0x208   : > { %v3767_v47 = vadd.f32 %v3766_v44, %v3765_v8  ;;  %v3868_v57 = vadd.f32 %v3867_v40, %v3866_v39  ;;  %v5110_v14 = vadd.f32 %v5068_v46, %v6524_v17  ;;  %v3615_v58 = vpop.f32.mrb[13].mxu0  ;;  %v3871_v60 = vsel %vm3746_vm3, %v3829_v42, 0.0 }
 0x209   : > { %v3869_v26 = vsel %vm3746_vm3, %v3828_v45, 0.0  ;;  %v5111_v15 = vadd.f32 %v3615_v58, %v6526_v18 }
 0x20a   : > { %v3870_v63 = vadd.f32 %v3869_v26, %v3868_v57  ;;  %v3769_v55 = vadd.f32 %v3768_v24, %v3767_v47  ;;  %v3831_v32 = vmul.f32 %v5110_v14, %v5110_v14  ;;  %v3772_v35 = vsel %vm3746_vm3, %v5110_v14, 0.0 }
 0x20b   : > { %v3770_v36 = vsel %vm3746_vm3, %v5111_v15, 0.0  ;;  %v3830_v41 = vmul.f32 %v5111_v15, %v5111_v15  ;;  %v4874_v48 = vpop.f32.mrb[16].mxu1  ;;  %v5071_v50 = vpop.f32.mrb[14].mxu0 }
 0x20c   : > { %v3771_v52 = vadd.f32 %v3770_v36, %v3769_v55  ;;  %v3872_v0 = vadd.f32 %v3871_v60, %v3870_v63  ;;  %v5112_v17 = vadd.f32 %v5071_v50, %v6528_v19  ;;  %v2074_v2 = vpop.f32.mrb[17].mxu1  ;;  %v3625_v16 = vpop.f32.mrb[15].mxu0  ;;  %v3875_v3 = vsel %vm3746_vm3, %v3831_v32, 0.0 }
 0x20d   : > { %v3873_v18 = vsel %vm3746_vm3, %v3830_v41, 0.0  ;;  %v5113_v43 = vadd.f32 %v3625_v16, %v6530_v20 }
 0x20e   : > { %v3874_v51 = vadd.f32 %v3873_v18, %v3872_v0  ;;  %v3773_v30 = vadd.f32 %v3772_v35, %v3771_v52  ;;  %v3833_v34 = vmul.f32 %v5112_v17, %v5112_v17  ;;  %v3776_v62 = vsel %vm3746_vm3, %v5112_v17, 0.0 }
 0x20f   : > { %v3774_v49 = vsel %vm3746_vm3, %v5113_v43, 0.0  ;;  %v3832_v53 = vmul.f32 %v5113_v43, %v5113_v43  ;;  %v4877_v7 = vpop.f32.mrb[18].mxu1  ;;  %v5074_v37 = vpop.f32.mrb[16].mxu0 }
 0x210   : > { %v3775_v54 = vadd.f32 %v3774_v49, %v3773_v30  ;;  %v3876_v19 = vadd.f32 %v3875_v3, %v3874_v51  ;;  %v5114_v56 = vadd.f32 %v5074_v37, %v4874_v48  ;;  %v2084_v59 = vpop.f32.mrb[19].mxu1  ;;  %v3635_v61 = vpop.f32.mrb[17].mxu0  ;;  %v3879_v6 = vsel %vm3746_vm3, %v3833_v34, 0.0 }
 0x211   : > { %v3877_v1 = vsel %vm3746_vm3, %v3832_v53, 0.0  ;;  %v5115_v20 = vadd.f32 %v3635_v61, %v2074_v2 }
 0x212   : > { %v3878_v4 = vadd.f32 %v3877_v1, %v3876_v19  ;;  %v3777_v5 = vadd.f32 %v3776_v62, %v3775_v54  ;;  %v3835_v9 = vmul.f32 %v5114_v56, %v5114_v56  ;;  %v3780_v31 = vsel %vm3746_vm3, %v5114_v56, 0.0 }
 0x213   : > { %v3778_v10 = vsel %vm3746_vm3, %v5115_v20, 0.0  ;;  %v3834_v11 = vmul.f32 %v5115_v20, %v5115_v20  ;;  %v4880_v21 = vpop.f32.mrb[20].mxu1  ;;  %v5077_v22 = vpop.f32.mrb[18].mxu0 }
 0x214   : > { %v3779_v23 = vadd.f32 %v3778_v10, %v3777_v5  ;;  %v3880_v25 = vadd.f32 %v3879_v6, %v3878_v4  ;;  %v5116_v27 = vadd.f32 %v5077_v22, %v4877_v7  ;;  %v2094_v28 = vpop.f32.mrb[21].mxu1  ;;  %v3645_v29 = vpop.f32.mrb[19].mxu0  ;;  %v3883_v39 = vsel %vm3746_vm3, %v3835_v9, 0.0 }
 0x215   : > { %v3881_v12 = vsel %vm3746_vm3, %v3834_v11, 0.0  ;;  %v5117_v33 = vadd.f32 %v3645_v29, %v2084_v59 }
 0x216   : > { %v3882_v38 = vadd.f32 %v3881_v12, %v3880_v25  ;;  %v3781_v13 = vadd.f32 %v3780_v31, %v3779_v23  ;;  %v3837_v8 = vmul.f32 %v5116_v27, %v5116_v27  ;;  %v3784_v24 = vsel %vm3746_vm3, %v5116_v27, 0.0 }
 0x217   : > { %v3782_v40 = vsel %vm3746_vm3, %v5117_v33, 0.0  ;;  %v3836_v42 = vmul.f32 %v5117_v33, %v5117_v33  ;;  %v4883_v44 = vpop.f32.mrb[22].mxu1  ;;  %v5080_v45 = vpop.f32.mrb[20].mxu0 }
 0x218   : > { %v3783_v46 = vadd.f32 %v3782_v40, %v3781_v13  ;;  %v3884_v47 = vadd.f32 %v3883_v39, %v3882_v38  ;;  %v5118_v57 = vadd.f32 %v5080_v45, %v4880_v21  ;;  %v2104_v14 = vpop.f32.mrb[23].mxu1  ;;  %v3655_v58 = vpop.f32.mrb[21].mxu0  ;;  %v3887_v60 = vsel %vm3746_vm3, %v3837_v8, 0.0 }
 0x219   : > { %v3885_v26 = vsel %vm3746_vm3, %v3836_v42, 0.0  ;;  %v5119_v15 = vadd.f32 %v3655_v58, %v2094_v28 }
 0x21a   : > { %v3886_v63 = vadd.f32 %v3885_v26, %v3884_v47  ;;  %v3785_v55 = vadd.f32 %v3784_v24, %v3783_v46  ;;  %v3839_v32 = vmul.f32 %v5118_v57, %v5118_v57  ;;  %v3788_v35 = vsel %vm3746_vm3, %v5118_v57, 0.0 }
 0x21b   : > { %v3786_v36 = vsel %vm3746_vm3, %v5119_v15, 0.0  ;;  %v3838_v41 = vmul.f32 %v5119_v15, %v5119_v15  ;;  %v4886_v48 = vpop.f32.mrb[24].mxu1  ;;  %v5083_v50 = vpop.f32.mrb[22].mxu0 }
 0x21c   : > { %v3787_v52 = vadd.f32 %v3786_v36, %v3785_v55  ;;  %v3888_v0 = vadd.f32 %v3887_v60, %v3886_v63  ;;  %v5120_v17 = vadd.f32 %v5083_v50, %v4883_v44  ;;  %v2114_v2 = vpop.f32.mrb[25].mxu1  ;;  %v3665_v16 = vpop.f32.mrb[23].mxu0  ;;  %v3891_v3 = vsel %vm3746_vm3, %v3839_v32, 0.0 }
 0x21d   : > { %v3889_v18 = vsel %vm3746_vm3, %v3838_v41, 0.0  ;;  %v5121_v43 = vadd.f32 %v3665_v16, %v2104_v14 }
 0x21e   : > { %v3890_v51 = vadd.f32 %v3889_v18, %v3888_v0  ;;  %v3789_v30 = vadd.f32 %v3788_v35, %v3787_v52  ;;  %v3841_v34 = vmul.f32 %v5120_v17, %v5120_v17  ;;  %v3792_v62 = vsel %vm3746_vm3, %v5120_v17, 0.0 }
 0x21f   : > { %v3790_v49 = vsel %vm3746_vm3, %v5121_v43, 0.0  ;;  %v3840_v53 = vmul.f32 %v5121_v43, %v5121_v43  ;;  %v4889_v7 = vpop.f32.mrb[26].mxu1  ;;  %v5086_v37 = vpop.f32.mrb[24].mxu0 }
 0x220   : > { %v3791_v54 = vadd.f32 %v3790_v49, %v3789_v30  ;;  %v3892_v19 = vadd.f32 %v3891_v3, %v3890_v51  ;;  %v5122_v56 = vadd.f32 %v5086_v37, %v4886_v48  ;;  %v2124_v59 = vpop.f32.mrb[27].mxu1  ;;  %v3675_v61 = vpop.f32.mrb[25].mxu0  ;;  %v3895_v6 = vsel %vm3746_vm3, %v3841_v34, 0.0 }
 0x221   : > { %v3893_v1 = vsel %vm3746_vm3, %v3840_v53, 0.0  ;;  %v5123_v20 = vadd.f32 %v3675_v61, %v2114_v2 }
 0x222   : > { %v3894_v4 = vadd.f32 %v3893_v1, %v3892_v19  ;;  %v3793_v5 = vadd.f32 %v3792_v62, %v3791_v54  ;;  %v3843_v9 = vmul.f32 %v5122_v56, %v5122_v56  ;;  %v3796_v31 = vsel %vm3746_vm3, %v5122_v56, 0.0 }
 0x223   : > { %v3794_v10 = vsel %vm3746_vm3, %v5123_v20, 0.0  ;;  %v3842_v11 = vmul.f32 %v5123_v20, %v5123_v20  ;;  %v4892_v21 = vpop.f32.mrb[28].mxu1  ;;  %v5089_v22 = vpop.f32.mrb[26].mxu0 }
 0x224   : > { %v3795_v23 = vadd.f32 %v3794_v10, %v3793_v5  ;;  %v3896_v25 = vadd.f32 %v3895_v6, %v3894_v4  ;;  %v5124_v27 = vadd.f32 %v5089_v22, %v4889_v7  ;;  %v2134_v28 = vpop.f32.mrb[29].mxu1  ;;  %v3685_v29 = vpop.f32.mrb[27].mxu0  ;;  %v3899_v39 = vsel %vm3746_vm3, %v3843_v9, 0.0 }
 0x225   : > { %v3897_v12 = vsel %vm3746_vm3, %v3842_v11, 0.0  ;;  %v5125_v33 = vadd.f32 %v3685_v29, %v2124_v59 }
 0x226   : > { %v3898_v38 = vadd.f32 %v3897_v12, %v3896_v25  ;;  %v3797_v13 = vadd.f32 %v3796_v31, %v3795_v23  ;;  %v3845_v8 = vmul.f32 %v5124_v27, %v5124_v27  ;;  %v3800_v24 = vsel %vm3746_vm3, %v5124_v27, 0.0 }
 0x227   : > { %v3798_v40 = vsel %vm3746_vm3, %v5125_v33, 0.0  ;;  %v3844_v42 = vmul.f32 %v5125_v33, %v5125_v33  ;;  %v4895_v44 = vpop.f32.mrb[30].mxu1  ;;  %v5092_v45 = vpop.f32.mrb[28].mxu0 }
 0x228   : > { %v3799_v46 = vadd.f32 %v3798_v40, %v3797_v13  ;;  %v3900_v47 = vadd.f32 %v3899_v39, %v3898_v38  ;;  %v5126_v57 = vadd.f32 %v5092_v45, %v4892_v21  ;;  %v2144_v14 = vpop.f32.mrb[31].mxu1  ;;  %v3695_v58 = vpop.f32.mrb[29].mxu0  ;;  %v3903_v60 = vsel %vm3746_vm3, %v3845_v8, 0.0 }
 0x229   : > { %v3901_v26 = vsel %vm3746_vm3, %v3844_v42, 0.0  ;;  %v5127_v15 = vadd.f32 %v3695_v58, %v2134_v28 }
 0x22a   : > { %v3902_v63 = vadd.f32 %v3901_v26, %v3900_v47  ;;  %v3801_v55 = vadd.f32 %v3800_v24, %v3799_v46  ;;  %v3847_v32 = vmul.f32 %v5126_v57, %v5126_v57  ;;  %v3804_v2 = vsel %vm3746_vm3, %v5126_v57, 0.0 }
 0x22b   : > { %v3802_v36 = vsel %vm3746_vm3, %v5127_v15, 0.0  ;;  %v3846_v41 = vmul.f32 %v5127_v15, %v5127_v15  ;;  %v5095_v48 = vpop.f32.mrb[30].mxu0 }
 0x22c   : > { %v3803_v50 = vadd.f32 %v3802_v36, %v3801_v55  ;;  %v3904_v52 = vadd.f32 %v3903_v60, %v3902_v63  ;;  %v5128_v0 = vadd.f32 %v5095_v48, %v4895_v44  ;;  %v3705_v17 = vpop.f32.mrb[31].mxu0  ;;  %v3907_v51 = vsel %vm3746_vm3, %v3847_v32, 0.0 }
 0x22d   : > { %v3905_v16 = vsel %vm3746_vm3, %v3846_v41, 0.0  ;;  %v5129_v35 = vadd.f32 %v3705_v17, %v2144_v14 }
 0x22e   : > { %v3906_v18 = vadd.f32 %v3905_v16, %v3904_v52  ;;  %v3805_v43 = vadd.f32 %v3804_v2, %v3803_v50  ;;  %v3849_v30 = vmul.f32 %v5128_v0, %v5128_v0  ;;  %v3808_v7 = vsel %vm3746_vm3, %v5128_v0, 0.0 }
 0x22f   : > { %v3806_v3 = vsel %vm3746_vm3, %v5129_v35, 0.0  ;;  %v3848_v34 = vmul.f32 %v5129_v35, %v5129_v35 }
 0x230   : > { %v3807_v49 = vadd.f32 %v3806_v3, %v3805_v43  ;;  %v3908_v53 = vadd.f32 %v3907_v51, %v3906_v18  ;;  %v3911_v56 = vsel %vm3746_vm3, %v3849_v30, 0.0 }
 0x231   : > { %v3909_v37 = vsel %vm3746_vm3, %v3848_v34, 0.0 }
 0x232   : > { %v3809_v54 = vadd.f32 %v3808_v7, %v3807_v49  ;;  %v3910_v19 = vadd.f32 %v3909_v37, %v3908_v53 }
 0x234   : > { %v3810_v59 = vrot.slane %v3809_v54, 4  ;;  %v3912_v61 = vadd.f32 %v3911_v56, %v3910_v19 }
 0x236   : > { %v3811_v62 = vadd.f32 %v3810_v59, %v3809_v54  ;;  %v3913_v1 = vrot.slane %v3912_v61, 4 }
 0x238   : > { %v3812_v20 = vrot.slane %v3811_v62, 2  ;;  %v3914_v4 = vadd.f32 %v3913_v1, %v3912_v61 }
 0x23a   : > { %v3813_v5 = vadd.f32 %v3812_v20, %v3811_v62  ;;  %v3915_v6 = vrot.slane %v3914_v4, 2 }
 0x23c   : > { %v3814_v9 = vrot.slane %v3813_v5, 1  ;;  %v3916_v10 = vadd.f32 %v3915_v6, %v3914_v4 }
 0x23e   : > { %v3815_v11 = vadd.f32 %v3814_v9, %v3813_v5  ;;  %v3917_v21 = vrot.slane %v3916_v10, 1 }
 0x240   : > { %3817 = vst.msk [vmem:[%s166_s4] sm:$0x1] %vm3816_vm4, %v3815_v11  ;;  %v3918_v22 = vadd.f32 %v3917_v21, %v3916_v10 }
 0x241   : > { %5412 = shalt.err (!%p5409_p3)
}
 0x242   : > { %s5413_s27 = scalar_lea.hbm %s6613_s10, 16  ;;  %s5417_s4 = scalar_lea.hbm %s6691_s2, 32 }
 0x243   : > { %p5414_p4 = scmp.ne.s32.totalorder %s6613_s10, %s5413_s27  ;;  %p5418_p9 = scmp.lt.u32.totalorder %s6613_s10, %s6691_s2 }
 0x244   : > { %p5419_p10 = scmp.lt.u32.totalorder %s5417_s4, %s5413_s27  ;;  %p5421_p12 = scmp.lt.u32.totalorder %s5413_s27, %s6613_s10 }
 0x245   : > { %p5415_p7 = pnand %p5414_p4, %p5556_p5 }
 0x246   : > { %p5420_p11 = por %p5419_p10, %p5418_p9 }
 0x247   : > { %p5416_p8 = pneg %p5415_p7 }
 0x248   : > { %p5422_p13 = por %p5421_p12, %p5420_p11 }
 0x24a   : > { %p5423_p0 = pnand %p5422_p13, %p5416_p8 }
 0x24c   : > { %5426 = shalt.err (!%p5423_p0)
}
 0x24d   : > { %5354 = dma.vmem_to_hbm [thread:$0]  (%p5556_p5), %s6615_s5, 16, %s6613_s10, %s3921_s19   ;;  %3919 = vst.msk [vmem:[%s172_s6] sm:$0x1] %vm3816_vm4, %v3918_v22 }
 0x24e   : > { %s3925_s16 = scalar_lea.sflag [#allocation6], %s6603_s29  ;;  %s5427_s11 = scalar_lea.vmem %s6623_s7, 16 }
 0x24f   : > { %p5428_p1 = scmp.ne.s32.totalorder %s6623_s7, %s5427_s11  ;;  %s5497_s20 = smov [#allocation5]  }
 0x250   : > { %s5431_s24 = sshll.u32 %s5497_s20, 4  ;;  %s5432_s24 = int_to_ptr.vmem [resolvable:$false] %s5431_s24 }
 0x251   : > { %p5429_p2 = pnand %p5428_p1, %p5556_p5  ;;  %s5433_s25 = scalar_lea.vmem %s5432_s24, 32 }
 0x252   : > { %p5434_p4 = scmp.lt.s32.totalorder %s6623_s7, %s5432_s24  ;;  %p5435_p7 = scmp.lt.s32.totalorder %s5433_s25, %s5427_s11 }
 0x253   : > { %p5430_p3 = pneg %p5429_p2 }
 0x254   : > { %p5436_p8 = por %p5435_p7, %p5434_p4 }
 0x256   : > { %p5437_p9 = pnand %p5436_p8, %p5430_p3 }
 0x258   : > { %5440 = shalt.err (!%p5437_p9)
}
 0x259   : > { %s5441_s29 = scalar_lea.hbm %s6621_s17, 16  ;;  %s5445_s10 = scalar_lea.hbm %s6692_s3, 32 }
 0x25a   : > { %p5442_p10 = scmp.ne.s32.totalorder %s6621_s17, %s5441_s29  ;;  %p5446_p13 = scmp.lt.u32.totalorder %s6621_s17, %s6692_s3 }
 0x25b   : > { %p5447_p0 = scmp.lt.u32.totalorder %s5445_s10, %s5441_s29  ;;  %p5449_p2 = scmp.lt.u32.totalorder %s5441_s29, %s6621_s17 }
 0x25c   : > { %p5443_p11 = pnand %p5442_p10, %p5556_p5 }
 0x25d   : > { %p5448_p1 = por %p5447_p0, %p5446_p13 }
 0x25e   : > { %p5444_p12 = pneg %p5443_p11 }
 0x25f   : > { %p5450_p3 = por %p5449_p2, %p5448_p1 }
 0x261   : > { %p5451_p4 = pnand %p5450_p3, %p5444_p12 }
 0x263   : > { %5454 = shalt.err (!%p5451_p4)
}
 0x264   : > { %5355 = dma.vmem_to_hbm [thread:$0]  (%p5556_p5), %s6623_s7, 16, %s6621_s17, %s3925_s16  }
 0x265 PF: > { %p5365_p7 = scmp.ge.s32.totalorder %s5493_s15, 2  ;;  %s3962_s27 = sand.u32 1, %s5481_s12  }
 0x266   : > { %s3963_s28 = scalar_lea.sflag [#allocation4], %s3962_s27 }
 0x267   : > { %p5359_p8 = pnand %p5365_p7, %p5560_p6 }
 0x269   : > { %5472 = dma.done.wait (!%p5359_p8), %s3963_s28, 16  }
 0x26a   : > { %5474 = vsyncadd (!%p5359_p8), %s3963_s28, 4294967280  ;;  %s3971_s30 = scalar_lea.sflag [#allocation6], %s3962_s27 }
 0x26b   : > { %5476 = dma.done.wait (!%p5359_p8), %s3971_s30, 16  }
 0x26c   : > { %5478 = vsyncadd (!%p5359_p8), %s3971_s30, 4294967280  ;;  %p17_p5 = scmp.ge.s32.totalorder %s5543_s18, 4   ;;  %s6803_s12 = smov %s5485_s13 }
 0x26d   : > { %s6804_s13 = smov %s5489_s14  ;;  %s6805_s14 = smov %s5554_s21 }
 0x26e   : > { %s6806_s15 = smov %s5543_s18  ;;  %19 = sbr.rel (!%p17_p5) target bundleno = 5 (0x5), region = 90 }
 0x275   :  { %3975 = vsyncpa [#allocation4], 1 }
 0x276   :  { %3977 = vsyncpa [#allocation4 + $0x1], 1 }
 0x277   :  { %3978 = vsyncpa [#allocation6], 1 }
 0x278   :  { %3980 = vsyncpa [#allocation6 + $0x1], 1 }

</bundles_post_ra>
